<compile_context>
chip_gen: v7x
topology: tpu7x:2x2x1
jax: 0.10.0
libtpu: 0.0.40
codegen_flags: <defaults>
</compile_context>

<pallas_src>
from math import ceil

import jax
import jax.numpy as jnp
from jax.experimental import pallas as pl
from jax.experimental.pallas import tpu as pltpu

# ---- module hyper-parameters: XConv(in_channels=8, out_channels=16, dim=3, kernel_size=8) ----
IN_CH = 8                       # C_in
OUT_CH = 16                     # C_out
DIM = 3                         # D  (point dimensionality)
KSIZE = 8                       # K  (neighbors incl. self)
HID = IN_CH // 4                # C_delta (hidden_channels default) = 2
CTOT = IN_CH + HID              # channels into the depthwise conv = 10
DEPTH_MULT = int(ceil(OUT_CH / CTOT))
EPS = 1e-5                      # BatchNorm eps

N_SRC = 512                     # source points (example)
N_DST = 256                     # target points (example)
TN_MAX = 512                    # max target points per grid step (raise to 1024 for huge clouds)

# ---- packed-weight slab layout: wmat (256 rows x 128 lanes), wvec (32 rows) ----
WCOLS = 128
R_A, R_B, R_C, R_O = 0, 88, 176, 240
WMAT_ROWS = 256
V_T1B, V_BE = 0, 16
WVEC_ROWS = 32


def _cdiv(a, b):
    return -(-a // b)


def _elu(x):
    # ELU(alpha=1).  The positive-branch exp is discarded by the where (finite or
    # inf, never NaN for finite inputs), so no clamping is needed.
    return jnp.where(x > 0, x, jnp.exp(x) - 1.0)


# --------------------------------- kernel ---------------------------------
def xconv_kernel(rpf_ref, xg_ref, wmat_ref, wvec_ref, out_ref):
    K, Cd, Cin, D = KSIZE, HID, IN_CH, DIM
    tn = out_ref.shape[1]

    def dot(a, b):
        return jnp.dot(a, b, preferred_element_type=jnp.float32)

    rpf = rpf_ref[...]                                            # (32, tn), row = d*K + k; d==3 is the constant-1 feature

    # Stage A (one MXU pass): mlp1 Linear(D, Cd) per neighbor (block-diag) stacked
    # with mlp2 Linear(D*K, K^2).  Biases ride on the constant-1 rows of rpf.
    # Rows 80..87 of the result are exactly 1 after ELU and carry stage-B biases.
    y = _elu(dot(wmat_ref[R_A:R_A + 88, 0:(D + 1) * K], rpf))     # (88, tn)

    # Stage B (one MXU pass): mlp1 Linear(Cd, Cd) (BN s1a/t1a folded) block-diag
    # with mlp2 grouped Conv1d #1 (BN s2a/t2a folded); biases from the ones rows.
    z = _elu(dot(wmat_ref[R_B:R_B + 88, 0:88], y))                # (88, tn)

    # mlp1 output; s1b is folded into the output weights, the remaining additive
    # term is t1b/s1b (lane-replicated, plain vadd).
    m1 = z[0:K * Cd, :] + wvec_ref[V_T1B:V_T1B + K * Cd, :]       # (16, tn), row = b*Cd + c

    # Stage C: mlp2 grouped Conv1d #2 (BN s2b/t2b and s2c/t2c folded), rows
    # permuted to neighbor-major (b*K + a); bias from the ones rows of z.
    tmat = dot(wmat_ref[R_C:R_C + K * K, 0:K * K + 8], z[K * Cd:88, :])   # (64, tn)

    # ---- X-transform (VPU): xt_*[c, a, n] = sum_b xcat[b*C + c, n] * T[b*K + a, n] ----
    xt_d = None
    xt_x = None
    for b in range(K):
        tb = tmat[b * K:(b + 1) * K, :][None, :, :]               # (1, K, tn), reused for both products
        pd = m1[b * Cd:(b + 1) * Cd, :][:, None, :] * tb          # (Cd,  K, tn)
        px = xg_ref[b * Cin:(b + 1) * Cin, :][:, None, :] * tb    # (Cin, K, tn), slice loaded from VMEM ref
        if b == 0:
            xt_d, xt_x = pd, px                                   # init from the b=0 product (no zeros+add)
        else:
            xt_d = xt_d + pd
            xt_x = xt_x + px

    # Final depthwise Conv1d + Linear, composed into a single (16, 80) matmul on
    # the concatenated X-transformed operand (both pieces are 8-sublane aligned).
    xt = jnp.concatenate([xt_d.reshape(Cd * K, tn), xt_x.reshape(Cin * K, tn)], axis=0)   # (80, tn)
    out = (dot(wmat_ref[R_O:R_O + OUT_CH, 0:(Cd + Cin) * K], xt)
           + wvec_ref[V_BE:V_BE + OUT_CH, :])
    out_ref[...] = out.astype(out_ref.dtype)


# --------------------------------- wrapper ---------------------------------
def xconv_forward(x, pos_from, pos_to, idx_from, idx_to, wmat, wvec, tn_max=TN_MAX):
    N, K, D, Cin = pos_to.shape[0], KSIZE, DIM, IN_CH

    # Tile size: as large as possible (per-step pipeline overhead ~0.35us) while
    # keeping an even grid of >= 2 steps so both v7x TensorCores are busy.
    g = max(2, _cdiv(N, tn_max))
    if g % 2:
        g += 1
    tn = max(128, min(tn_max, _cdiv(_cdiv(N, g), 128) * 128))
    npad = _cdiv(N, tn) * tn
    pad = npad - N

    # TODO(synk): neighbor selection (knn_graph + dilation sampling) stays outside the
    # kernel; for very large clouds the gathers below could move in-kernel via
    # scalar-prefetched indices + make_async_copy to avoid the gathered-array HBM round trip.
    idx_f_km = jnp.pad(idx_from.reshape(N, K).T, ((0, 0), (0, pad)))     # (K, npad)
    idx_t_km = jnp.pad(idx_to.reshape(N, K).T, ((0, 0), (0, pad)))       # (K, npad)

    # Gather directly into the kernel's feature-major, point-on-lanes layout
    # (no post-gather transpose pass).  A constant-1 position feature is appended
    # so the first-stage biases ride inside the MXU matmul.
    pto_aug = jnp.concatenate(
        [pos_to.astype(jnp.float32), jnp.ones((pos_to.shape[0], 1), jnp.float32)], axis=1)
    pfrom_aug = jnp.concatenate(
        [pos_from.astype(jnp.float32), jnp.zeros((pos_from.shape[0], 1), jnp.float32)], axis=1)
    d_idx = jnp.arange(D + 1)
    pto_g = pto_aug[idx_t_km[None, :, :], d_idx[:, None, None]]          # (D+1, K, npad)
    pfrom_g = pfrom_aug[idx_f_km[None, :, :], d_idx[:, None, None]]      # (D+1, K, npad)
    rpf = (pto_g - pfrom_g).reshape((D + 1) * K, npad)                   # (32, npad), row = d*K + k

    c_idx = jnp.arange(Cin)
    xg = x.astype(jnp.float32)[idx_f_km[:, None, :], c_idx[None, :, None]]   # (K, Cin, npad)
    xg = xg.reshape(K * Cin, npad)                                        # row = k*Cin + c

    wvec_t = jnp.broadcast_to(wvec[:, None], (WVEC_ROWS, tn))             # lane-replicated biases

    out_t = pl.pallas_call(
        xconv_kernel,
        out_shape=jax.ShapeDtypeStruct((OUT_CH, npad), jnp.float32),
        grid=(npad // tn,),
        in_specs=[
            pl.BlockSpec(((D + 1) * K, tn), lambda i: (0, i)),
            pl.BlockSpec((K * Cin, tn), lambda i: (0, i)),
            pl.BlockSpec((WMAT_ROWS, WCOLS), lambda i: (0, 0)),
            pl.BlockSpec((WVEC_ROWS, tn), lambda i: (0, 0)),
        ],
        out_specs=pl.BlockSpec((OUT_CH, tn), lambda i: (0, i)),
        compiler_params=pltpu.CompilerParams(dimension_semantics=("parallel",)),
    )(rpf, xg, wmat, wvec_t)

    return jnp.transpose(out_t[:, :N])                                    # (N, C_out)


# --------------------- deterministic parameter init ---------------------
def _fold_bn(key, c):
    # TODO(synk): BatchNorm1d is realized in eval/inference mode (affine with fixed
    # running stats); training-mode batch statistics are not reproduced.
    k1, k2, k3, k4 = jax.random.split(key, 4)
    gamma = jax.random.uniform(k1, (c,), jnp.float32, 0.5, 1.5)
    beta = 0.1 * jax.random.normal(k2, (c,), jnp.float32)
    mean = 0.1 * jax.random.normal(k3, (c,), jnp.float32)
    var = jax.random.uniform(k4, (c,), jnp.float32, 0.5, 1.5)
    scale = gamma / jnp.sqrt(var + EPS)
    shift = beta - mean * scale
    return scale, shift


def init_raw_params(key):
    """Parameters in their native (PyTorch-shaped) form."""
    K = KSIZE
    ks = jax.random.split(key, 19)
    p = {}
    p['w1a'] = 0.3 * jax.random.normal(ks[0], (HID, DIM), jnp.float32)
    p['b1a'] = 0.1 * jax.random.normal(ks[1], (HID,), jnp.float32)
    p['s1a'], p['t1a'] = _fold_bn(ks[2], HID)
    p['w1b'] = 0.3 * jax.random.normal(ks[3], (HID, HID), jnp.float32)
    p['b1b'] = 0.1 * jax.random.normal(ks[4], (HID,), jnp.float32)
    p['s1b'], p['t1b'] = _fold_bn(ks[5], HID)

    p['w2'] = 0.2 * jax.random.normal(ks[6], (K * K, DIM * K), jnp.float32)
    p['b2'] = 0.1 * jax.random.normal(ks[7], (K * K,), jnp.float32)
    p['s2a'], p['t2a'] = _fold_bn(ks[8], K * K)
    p['wc1'] = 0.2 * jax.random.normal(ks[9], (K * K, 1, K), jnp.float32)   # Conv1d(K,K^2,K,groups=K)
    p['bc1'] = 0.1 * jax.random.normal(ks[10], (K * K,), jnp.float32)
    p['s2b'], p['t2b'] = _fold_bn(ks[11], K * K)
    p['wc2'] = 0.2 * jax.random.normal(ks[12], (K * K, 1, K), jnp.float32)
    p['bc2'] = 0.1 * jax.random.normal(ks[13], (K * K,), jnp.float32)
    p['s2c'], p['t2c'] = _fold_bn(ks[14], K * K)

    p['wf'] = 0.2 * jax.random.normal(ks[15], (CTOT * DEPTH_MULT, 1, K), jnp.float32)  # depthwise conv
    p['bf'] = 0.1 * jax.random.normal(ks[16], (CTOT * DEPTH_MULT,), jnp.float32)
    p['wl'] = 0.2 * jax.random.normal(ks[17], (OUT_CH, CTOT * DEPTH_MULT), jnp.float32)
    p['bl'] = 0.1 * jax.random.normal(ks[18], (OUT_CH,), jnp.float32)
    return p


def pack_params(p):
    """Host-side folding/packing into wmat (256,128) and wvec (32,).

    All eval-mode BatchNorm affines are folded into adjacent linears/convs, the
    grouped convs and per-neighbor linears become block-diagonal matrices, the
    two grouped-conv stages are stacked with the mlp1 stages into shared MXU
    passes, the second grouped conv's rows are permuted to neighbor-major, the
    depthwise conv + final Linear are composed into one (16, 80) map (with s1b
    folded in), and most biases become weight columns read from constant-1 rows.
    """
    K, D, Cd, Cin, O, dm = KSIZE, DIM, HID, IN_CH, OUT_CH, DEPTH_MULT
    f32 = jnp.float32
    eyeK = jnp.eye(K, dtype=f32)
    bias_col_A = D * K            # rpf column carrying the constant-1 feature (=24)
    ones_col_B = 80               # row index of the constant-1 rows of y / z

    # ---- stage A: Linear(D, Cd) per neighbor (block-diag) + Linear(D*K, K^2) ----
    wA = jnp.zeros((88, (D + 1) * K), f32)
    w1a_blk = (p['w1a'][None, :, :, None] * eyeK[:, None, None, :]).reshape(K * Cd, D * K)
    wA = wA.at[0:K * Cd, 0:D * K].set(w1a_blk)
    wA = wA.at[0:K * Cd, bias_col_A].set(jnp.tile(p['b1a'], K))
    w2_remap = jnp.transpose(p['w2'].reshape(K * K, K, D), (0, 2, 1)).reshape(K * K, D * K)
    wA = wA.at[K * Cd:K * Cd + K * K, 0:D * K].set(w2_remap)
    wA = wA.at[K * Cd:K * Cd + K * K, bias_col_A].set(p['b2'])
    wA = wA.at[80:88, bias_col_A].set(1.0)                      # ones rows: ELU(1) = 1

    # ---- stage B: Linear(Cd,Cd) (BN s1a/t1a folded) + grouped Conv1d #1 (BN s2a/t2a folded) ----
    w1b_f = p['w1b'] * p['s1a'][None, :]
    b1b_f = p['b1b'] + p['w1b'] @ p['t1a']
    w1b_blk = jnp.kron(eyeK, w1b_f)                             # (16, 16)
    wc1 = p['wc1'].reshape(K, K, K)
    s2a, t2a = p['s2a'].reshape(K, K), p['t2a'].reshape(K, K)
    wc1_f = wc1 * s2a[:, None, :]
    bc1_f = p['bc1'] + jnp.einsum('gbl,gl->gb', wc1, t2a).reshape(K * K)
    wc1_bd = (wc1_f[:, :, None, :] * eyeK[:, None, :, None]).reshape(K * K, K * K)
    wB = jnp.zeros((88, 88), f32)
    wB = wB.at[0:16, 0:16].set(w1b_blk)
    wB = wB.at[0:16, ones_col_B].set(jnp.tile(b1b_f, K))
    wB = wB.at[16:80, 16:80].set(wc1_bd)
    wB = wB.at[16:80, ones_col_B].set(bc1_f)
    wB = wB.at[80:88, ones_col_B].set(1.0)                      # propagate the ones rows

    # ---- stage C: grouped Conv1d #2 (BN s2b/t2b input-side, s2c/t2c output-side folded),
    #      rows permuted to neighbor-major (b*K + a) ----
    wc2 = p['wc2'].reshape(K, K, K)
    s2b, t2b = p['s2b'].reshape(K, K), p['t2b'].reshape(K, K)
    wc2_f = wc2 * s2b[:, None, :]
    bc2_f = p['bc2'] + jnp.einsum('gbl,gl->gb', wc2, t2b).reshape(K * K)
    wc2_ff = wc2_f * p['s2c'].reshape(K, K)[:, :, None]
    bc2_ff = p['s2c'] * bc2_f + p['t2c']
    wc2_bd = (wc2_ff[:, :, None, :] * eyeK[:, None, :, None]).reshape(K * K, K * K)
    idx = jnp.arange(K * K)
    perm = (idx % K) * K + idx // K                             # rows (a*K+b) -> (b*K+a)
    wc2_bd = wc2_bd[perm]
    bc2_p = bc2_ff[perm]
    wC = jnp.zeros((64, 72), f32)
    wC = wC.at[:, 0:64].set(wc2_bd)
    wC = wC.at[:, 64].set(bc2_p)                                # bias column (reads z's ones row)

    # ---- depthwise conv + final Linear composed; BN s1b folded into the mlp1 columns ----
    wf = p['wf'].reshape(CTOT, dm, K)                           # [c, m, a]
    wl = p['wl'].reshape(O, CTOT, dm)                           # [o, c, m]
    weff = jnp.einsum('ocm,cma->oca', wl, wf)                   # (O, CTOT, K)
    beff = p['bl'] + jnp.einsum('ocm,cm->o', wl, p['bf'].reshape(CTOT, dm))
    weff_d = (weff[:, :Cd, :] * p['s1b'][None, :, None]).reshape(O, Cd * K)   # col = c*K + a
    weff_x = weff[:, Cd:, :].reshape(O, Cin * K)
    wO = jnp.concatenate([weff_d, weff_x], axis=1)              # (16, 80)

    def pad_to(m, rows):
        return jnp.pad(m, ((0, rows - m.shape[0]), (0, WCOLS - m.shape[1])))

    wmat = jnp.concatenate([pad_to(wA, 88), pad_to(wB, 88), pad_to(wC, 64), pad_to(wO, 16)],
                           axis=0)
    t1b_adj = p['t1b'] / p['s1b']                               # additive term left after folding s1b
    wvec = jnp.concatenate([jnp.tile(t1b_adj, K), beff]).astype(f32)
    assert wmat.shape == (WMAT_ROWS, WCOLS)
    assert wvec.shape == (WVEC_ROWS,)
    return wmat.astype(f32), wvec


# --------------- pure-JAX reference (un-folded module structure) ---------------
def xconv_reference(x, pos_from, pos_to, idx_from, idx_to, p):
    N, K, D = pos_to.shape[0], KSIZE, DIM
    hi = jax.lax.Precision.HIGHEST
    rel = (pos_to[idx_to] - pos_from[idx_from]).astype(jnp.float32)       # (N*K, D)

    # mlp1
    y = jnp.einsum('nd,cd->nc', rel, p['w1a'], precision=hi) + p['b1a']
    y = _elu(y) * p['s1a'] + p['t1a']
    y = jnp.einsum('nd,cd->nc', y, p['w1b'], precision=hi) + p['b1b']
    y = _elu(y) * p['s1b'] + p['t1b']
    x_star = y.reshape(N, K, HID)
    xg = x[idx_from].reshape(N, K, IN_CH).astype(jnp.float32)
    x_star = jnp.concatenate([x_star, xg], axis=-1)                       # (N, K, CTOT)
    x_star = jnp.transpose(x_star, (0, 2, 1))                             # (N, CTOT, K)

    # mlp2
    t = jnp.einsum('nq,uq->nu', rel.reshape(N, K * D), p['w2'], precision=hi) + p['b2']
    t = _elu(t) * p['s2a'] + p['t2a']
    wc1 = p['wc1'].reshape(K, K, K)
    t = jnp.einsum('ngl,gbl->ngb', t.reshape(N, K, K), wc1, precision=hi) + p['bc1'].reshape(K, K)
    t = _elu(t.reshape(N, K * K)) * p['s2b'] + p['t2b']
    wc2 = p['wc2'].reshape(K, K, K)
    t = jnp.einsum('ngl,gbl->ngb', t.reshape(N, K, K), wc2, precision=hi) + p['bc2'].reshape(K, K)
    t = t.reshape(N, K * K) * p['s2c'] + p['t2c']
    tmat = t.reshape(N, K, K)                                             # T[n, a, b]

    # X-transform
    xt = jnp.einsum('nab,ncb->nca', tmat, x_star, precision=hi)           # (N, CTOT, K)

    # depthwise Conv1d + final Linear
    wf = p['wf'].reshape(CTOT, DEPTH_MULT, K)
    conv = jnp.einsum('nca,cma->ncm', xt, wf, precision=hi) + p['bf'].reshape(CTOT, DEPTH_MULT)
    out = jnp.einsum('nj,oj->no', conv.reshape(N, CTOT * DEPTH_MULT), p['wl'], precision=hi) + p['bl']
    return out


if __name__ == "__main__":
    key = jax.random.PRNGKey(0)
    kx, kpf, kpt, ke, kp = jax.random.split(key, 5)
    x = jax.random.normal(kx, (N_SRC, IN_CH), jnp.float32)
    pos_from = jax.random.normal(kpf, (N_SRC, DIM), jnp.float32)
    pos_to = jax.random.normal(kpt, (N_DST, DIM), jnp.float32)
    # edge_index: each target point has K neighbors (grouped per target, as
    # required by the module's .view(N, K, ...) calls).
    idx_from = jax.random.randint(ke, (N_DST * KSIZE,), 0, N_SRC)
    idx_to = jnp.repeat(jnp.arange(N_DST), KSIZE)

    raw = init_raw_params(kp)
    wmat, wvec = pack_params(raw)

    out = xconv_forward(x, pos_from, pos_to, idx_from, idx_to, wmat, wvec)
    out = jax.block_until_ready(out)

    ref = xconv_reference(x, pos_from, pos_to, idx_from, idx_to, raw)
    assert out.shape == (N_DST, OUT_CH)
    err = float(jnp.max(jnp.abs(out - ref)))
    assert jnp.allclose(out, ref, rtol=2e-4, atol=2e-4), err
    print("KERNEL_OK")
</pallas_src>

<mosaic_0001>
module attributes {stable_mosaic.version = 11 : i64} {
  func.func @xconv_kernel(%arg0: i32, %arg1: memref<32x128xf32, #tpu.memory_space<vmem>>, %arg2: memref<64x128xf32, #tpu.memory_space<vmem>>, %arg3: memref<256x128xf32, #tpu.memory_space<vmem>>, %arg4: memref<32x128xf32, #tpu.memory_space<vmem>>, %arg5: memref<16x128xf32, #tpu.memory_space<vmem>>) attributes {dimension_semantics = [#tpu.dimension_semantics<parallel>], iteration_bounds = array<i64: 2>, scalar_prefetch = 0 : i64, scratch_operands = 0 : i64, tpu.core_type = #tpu.core_type<tc>, window_params = [{transform_indices = @transform_0, window_bounds = array<i64: 32, 128>}, {transform_indices = @transform_1, window_bounds = array<i64: 64, 128>}, {pipeline_mode = #tpu.pipeline_mode<synchronous>, transform_indices = @transform_2, window_bounds = array<i64: 256, 128>}, {pipeline_mode = #tpu.pipeline_mode<synchronous>, transform_indices = @transform_3, window_bounds = array<i64: 32, 128>}, {transform_indices = @transform_4, window_bounds = array<i64: 16, 128>}]} {
    %c0 = arith.constant 0 : index
    %c0_0 = arith.constant 0 : index
    %0 = vector.load %arg1[%c0, %c0_0] : memref<32x128xf32, #tpu.memory_space<vmem>>, vector<32x128xf32>
    %c0_1 = arith.constant 0 : index
    %c0_2 = arith.constant 0 : index
    %1 = vector.load %arg3[%c0_1, %c0_2] : memref<256x128xf32, #tpu.memory_space<vmem>>, vector<88x32xf32>
    %cst = arith.constant dense<0.000000e+00> : vector<88x128xf32>
    %2 = tpu.matmul %1, %0, %cst {dimension_numbers = #tpu.dot_dimension_numbers<[1], [0], [0], [1], [0, 0, 1, 1], [], []>} : vector<88x32xf32>, vector<32x128xf32>, vector<88x128xf32> -> vector<88x128xf32>
    %cst_3 = arith.constant 0.000000e+00 : f32
    %3 = vector.broadcast %cst_3 : f32 to vector<88x128xf32>
    %4 = arith.cmpf ogt, %2, %3 : vector<88x128xf32>
    %5 = math.exp %2 : vector<88x128xf32>
    %cst_4 = arith.constant 1.000000e+00 : f32
    %6 = vector.broadcast %cst_4 : f32 to vector<88x128xf32>
    %7 = arith.subf %5, %6 : vector<88x128xf32>
    %8 = arith.select %4, %2, %7 : vector<88x128xi1>, vector<88x128xf32>
    %c88 = arith.constant 88 : index
    %c0_5 = arith.constant 0 : index
    %9 = vector.load %arg3[%c88, %c0_5] : memref<256x128xf32, #tpu.memory_space<vmem>>, vector<88x88xf32>
    %cst_6 = arith.constant dense<0.000000e+00> : vector<88x128xf32>
    %10 = tpu.matmul %9, %8, %cst_6 {dimension_numbers = #tpu.dot_dimension_numbers<[1], [0], [0], [1], [0, 0, 1, 1], [], []>} : vector<88x88xf32>, vector<88x128xf32>, vector<88x128xf32> -> vector<88x128xf32>
    %cst_7 = arith.constant 0.000000e+00 : f32
    %11 = vector.broadcast %cst_7 : f32 to vector<88x128xf32>
    %12 = arith.cmpf ogt, %10, %11 : vector<88x128xf32>
    %13 = math.exp %10 : vector<88x128xf32>
    %cst_8 = arith.constant 1.000000e+00 : f32
    %14 = vector.broadcast %cst_8 : f32 to vector<88x128xf32>
    %15 = arith.subf %13, %14 : vector<88x128xf32>
    %16 = arith.select %12, %10, %15 : vector<88x128xi1>, vector<88x128xf32>
    %17 = vector.extract_strided_slice %16 {offsets = [0, 0], sizes = [16, 128], strides = [1, 1]} : vector<88x128xf32> to vector<16x128xf32>
    %c0_9 = arith.constant 0 : index
    %c0_10 = arith.constant 0 : index
    %18 = vector.load %arg4[%c0_9, %c0_10] : memref<32x128xf32, #tpu.memory_space<vmem>>, vector<16x128xf32>
    %19 = arith.addf %17, %18 : vector<16x128xf32>
    %c176 = arith.constant 176 : index
    %c0_11 = arith.constant 0 : index
    %20 = vector.load %arg3[%c176, %c0_11] : memref<256x128xf32, #tpu.memory_space<vmem>>, vector<64x72xf32>
    %21 = vector.extract_strided_slice %16 {offsets = [16, 0], sizes = [72, 128], strides = [1, 1]} : vector<88x128xf32> to vector<72x128xf32>
    %cst_12 = arith.constant dense<0.000000e+00> : vector<64x128xf32>
    %22 = tpu.matmul %20, %21, %cst_12 {dimension_numbers = #tpu.dot_dimension_numbers<[1], [0], [0], [1], [0, 0, 1, 1], [], []>} : vector<64x72xf32>, vector<72x128xf32>, vector<64x128xf32> -> vector<64x128xf32>
    %23 = vector.extract_strided_slice %22 {offsets = [0, 0], sizes = [8, 128], strides = [1, 1]} : vector<64x128xf32> to vector<8x128xf32>
    %24 = vector.shape_cast %23 : vector<8x128xf32> to vector<1x8x128xf32>
    %25 = vector.extract_strided_slice %19 {offsets = [0, 0], sizes = [2, 128], strides = [1, 1]} : vector<16x128xf32> to vector<2x128xf32>
    %26 = vector.shape_cast %25 : vector<2x128xf32> to vector<2x1x128xf32>
    %27 = vector.broadcast %26 : vector<2x1x128xf32> to vector<2x8x128xf32>
    %28 = vector.broadcast %24 : vector<1x8x128xf32> to vector<2x8x128xf32>
    %29 = arith.mulf %27, %28 : vector<2x8x128xf32>
    %c0_13 = arith.constant 0 : index
    %c0_14 = arith.constant 0 : index
    %30 = vector.load %arg2[%c0_13, %c0_14] : memref<64x128xf32, #tpu.memory_space<vmem>>, vector<8x128xf32>
    %31 = vector.shape_cast %30 : vector<8x128xf32> to vector<8x1x128xf32>
    %32 = vector.broadcast %31 : vector<8x1x128xf32> to vector<8x8x128xf32>
    %33 = vector.broadcast %24 : vector<1x8x128xf32> to vector<8x8x128xf32>
    %34 = arith.mulf %32, %33 : vector<8x8x128xf32>
    %35 = vector.extract_strided_slice %22 {offsets = [8, 0], sizes = [8, 128], strides = [1, 1]} : vector<64x128xf32> to vector<8x128xf32>
    %36 = vector.shape_cast %35 : vector<8x128xf32> to vector<1x8x128xf32>
    %37 = vector.extract_strided_slice %19 {offsets = [2, 0], sizes = [2, 128], strides = [1, 1]} : vector<16x128xf32> to vector<2x128xf32>
    %38 = vector.shape_cast %37 : vector<2x128xf32> to vector<2x1x128xf32>
    %39 = vector.broadcast %38 : vector<2x1x128xf32> to vector<2x8x128xf32>
    %40 = vector.broadcast %36 : vector<1x8x128xf32> to vector<2x8x128xf32>
    %41 = arith.mulf %39, %40 : vector<2x8x128xf32>
    %c8 = arith.constant 8 : index
    %c0_15 = arith.constant 0 : index
    %42 = vector.load %arg2[%c8, %c0_15] : memref<64x128xf32, #tpu.memory_space<vmem>>, vector<8x128xf32>
    %43 = vector.shape_cast %42 : vector<8x128xf32> to vector<8x1x128xf32>
    %44 = vector.broadcast %43 : vector<8x1x128xf32> to vector<8x8x128xf32>
    %45 = vector.broadcast %36 : vector<1x8x128xf32> to vector<8x8x128xf32>
    %46 = arith.mulf %44, %45 : vector<8x8x128xf32>
    %47 = arith.addf %29, %41 : vector<2x8x128xf32>
    %48 = arith.addf %34, %46 : vector<8x8x128xf32>
    %49 = vector.extract_strided_slice %22 {offsets = [16, 0], sizes = [8, 128], strides = [1, 1]} : vector<64x128xf32> to vector<8x128xf32>
    %50 = vector.shape_cast %49 : vector<8x128xf32> to vector<1x8x128xf32>
    %51 = vector.extract_strided_slice %19 {offsets = [4, 0], sizes = [2, 128], strides = [1, 1]} : vector<16x128xf32> to vector<2x128xf32>
    %52 = vector.shape_cast %51 : vector<2x128xf32> to vector<2x1x128xf32>
    %53 = vector.broadcast %52 : vector<2x1x128xf32> to vector<2x8x128xf32>
    %54 = vector.broadcast %50 : vector<1x8x128xf32> to vector<2x8x128xf32>
    %55 = arith.mulf %53, %54 : vector<2x8x128xf32>
    %c16 = arith.constant 16 : index
    %c0_16 = arith.constant 0 : index
    %56 = vector.load %arg2[%c16, %c0_16] : memref<64x128xf32, #tpu.memory_space<vmem>>, vector<8x128xf32>
    %57 = vector.shape_cast %56 : vector<8x128xf32> to vector<8x1x128xf32>
    %58 = vector.broadcast %57 : vector<8x1x128xf32> to vector<8x8x128xf32>
    %59 = vector.broadcast %50 : vector<1x8x128xf32> to vector<8x8x128xf32>
    %60 = arith.mulf %58, %59 : vector<8x8x128xf32>
    %61 = arith.addf %47, %55 : vector<2x8x128xf32>
    %62 = arith.addf %48, %60 : vector<8x8x128xf32>
    %63 = vector.extract_strided_slice %22 {offsets = [24, 0], sizes = [8, 128], strides = [1, 1]} : vector<64x128xf32> to vector<8x128xf32>
    %64 = vector.shape_cast %63 : vector<8x128xf32> to vector<1x8x128xf32>
    %65 = vector.extract_strided_slice %19 {offsets = [6, 0], sizes = [2, 128], strides = [1, 1]} : vector<16x128xf32> to vector<2x128xf32>
    %66 = vector.shape_cast %65 : vector<2x128xf32> to vector<2x1x128xf32>
    %67 = vector.broadcast %66 : vector<2x1x128xf32> to vector<2x8x128xf32>
    %68 = vector.broadcast %64 : vector<1x8x128xf32> to vector<2x8x128xf32>
    %69 = arith.mulf %67, %68 : vector<2x8x128xf32>
    %c24 = arith.constant 24 : index
    %c0_17 = arith.constant 0 : index
    %70 = vector.load %arg2[%c24, %c0_17] : memref<64x128xf32, #tpu.memory_space<vmem>>, vector<8x128xf32>
    %71 = vector.shape_cast %70 : vector<8x128xf32> to vector<8x1x128xf32>
    %72 = vector.broadcast %71 : vector<8x1x128xf32> to vector<8x8x128xf32>
    %73 = vector.broadcast %64 : vector<1x8x128xf32> to vector<8x8x128xf32>
    %74 = arith.mulf %72, %73 : vector<8x8x128xf32>
    %75 = arith.addf %61, %69 : vector<2x8x128xf32>
    %76 = arith.addf %62, %74 : vector<8x8x128xf32>
    %77 = vector.extract_strided_slice %22 {offsets = [32, 0], sizes = [8, 128], strides = [1, 1]} : vector<64x128xf32> to vector<8x128xf32>
    %78 = vector.shape_cast %77 : vector<8x128xf32> to vector<1x8x128xf32>
    %79 = vector.extract_strided_slice %19 {offsets = [8, 0], sizes = [2, 128], strides = [1, 1]} : vector<16x128xf32> to vector<2x128xf32>
    %80 = vector.shape_cast %79 : vector<2x128xf32> to vector<2x1x128xf32>
    %81 = vector.broadcast %80 : vector<2x1x128xf32> to vector<2x8x128xf32>
    %82 = vector.broadcast %78 : vector<1x8x128xf32> to vector<2x8x128xf32>
    %83 = arith.mulf %81, %82 : vector<2x8x128xf32>
    %c32 = arith.constant 32 : index
    %c0_18 = arith.constant 0 : index
    %84 = vector.load %arg2[%c32, %c0_18] : memref<64x128xf32, #tpu.memory_space<vmem>>, vector<8x128xf32>
    %85 = vector.shape_cast %84 : vector<8x128xf32> to vector<8x1x128xf32>
    %86 = vector.broadcast %85 : vector<8x1x128xf32> to vector<8x8x128xf32>
    %87 = vector.broadcast %78 : vector<1x8x128xf32> to vector<8x8x128xf32>
    %88 = arith.mulf %86, %87 : vector<8x8x128xf32>
    %89 = arith.addf %75, %83 : vector<2x8x128xf32>
    %90 = arith.addf %76, %88 : vector<8x8x128xf32>
    %91 = vector.extract_strided_slice %22 {offsets = [40, 0], sizes = [8, 128], strides = [1, 1]} : vector<64x128xf32> to vector<8x128xf32>
    %92 = vector.shape_cast %91 : vector<8x128xf32> to vector<1x8x128xf32>
    %93 = vector.extract_strided_slice %19 {offsets = [10, 0], sizes = [2, 128], strides = [1, 1]} : vector<16x128xf32> to vector<2x128xf32>
    %94 = vector.shape_cast %93 : vector<2x128xf32> to vector<2x1x128xf32>
    %95 = vector.broadcast %94 : vector<2x1x128xf32> to vector<2x8x128xf32>
    %96 = vector.broadcast %92 : vector<1x8x128xf32> to vector<2x8x128xf32>
    %97 = arith.mulf %95, %96 : vector<2x8x128xf32>
    %c40 = arith.constant 40 : index
    %c0_19 = arith.constant 0 : index
    %98 = vector.load %arg2[%c40, %c0_19] : memref<64x128xf32, #tpu.memory_space<vmem>>, vector<8x128xf32>
    %99 = vector.shape_cast %98 : vector<8x128xf32> to vector<8x1x128xf32>
    %100 = vector.broadcast %99 : vector<8x1x128xf32> to vector<8x8x128xf32>
    %101 = vector.broadcast %92 : vector<1x8x128xf32> to vector<8x8x128xf32>
    %102 = arith.mulf %100, %101 : vector<8x8x128xf32>
    %103 = arith.addf %89, %97 : vector<2x8x128xf32>
    %104 = arith.addf %90, %102 : vector<8x8x128xf32>
    %105 = vector.extract_strided_slice %22 {offsets = [48, 0], sizes = [8, 128], strides = [1, 1]} : vector<64x128xf32> to vector<8x128xf32>
    %106 = vector.shape_cast %105 : vector<8x128xf32> to vector<1x8x128xf32>
    %107 = vector.extract_strided_slice %19 {offsets = [12, 0], sizes = [2, 128], strides = [1, 1]} : vector<16x128xf32> to vector<2x128xf32>
    %108 = vector.shape_cast %107 : vector<2x128xf32> to vector<2x1x128xf32>
    %109 = vector.broadcast %108 : vector<2x1x128xf32> to vector<2x8x128xf32>
    %110 = vector.broadcast %106 : vector<1x8x128xf32> to vector<2x8x128xf32>
    %111 = arith.mulf %109, %110 : vector<2x8x128xf32>
    %c48 = arith.constant 48 : index
    %c0_20 = arith.constant 0 : index
    %112 = vector.load %arg2[%c48, %c0_20] : memref<64x128xf32, #tpu.memory_space<vmem>>, vector<8x128xf32>
    %113 = vector.shape_cast %112 : vector<8x128xf32> to vector<8x1x128xf32>
    %114 = vector.broadcast %113 : vector<8x1x128xf32> to vector<8x8x128xf32>
    %115 = vector.broadcast %106 : vector<1x8x128xf32> to vector<8x8x128xf32>
    %116 = arith.mulf %114, %115 : vector<8x8x128xf32>
    %117 = arith.addf %103, %111 : vector<2x8x128xf32>
    %118 = arith.addf %104, %116 : vector<8x8x128xf32>
    %119 = vector.extract_strided_slice %22 {offsets = [56, 0], sizes = [8, 128], strides = [1, 1]} : vector<64x128xf32> to vector<8x128xf32>
    %120 = vector.shape_cast %119 : vector<8x128xf32> to vector<1x8x128xf32>
    %121 = vector.extract_strided_slice %19 {offsets = [14, 0], sizes = [2, 128], strides = [1, 1]} : vector<16x128xf32> to vector<2x128xf32>
    %122 = vector.shape_cast %121 : vector<2x128xf32> to vector<2x1x128xf32>
    %123 = vector.broadcast %122 : vector<2x1x128xf32> to vector<2x8x128xf32>
    %124 = vector.broadcast %120 : vector<1x8x128xf32> to vector<2x8x128xf32>
    %125 = arith.mulf %123, %124 : vector<2x8x128xf32>
    %c56 = arith.constant 56 : index
    %c0_21 = arith.constant 0 : index
    %126 = vector.load %arg2[%c56, %c0_21] : memref<64x128xf32, #tpu.memory_space<vmem>>, vector<8x128xf32>
    %127 = vector.shape_cast %126 : vector<8x128xf32> to vector<8x1x128xf32>
    %128 = vector.broadcast %127 : vector<8x1x128xf32> to vector<8x8x128xf32>
    %129 = vector.broadcast %120 : vector<1x8x128xf32> to vector<8x8x128xf32>
    %130 = arith.mulf %128, %129 : vector<8x8x128xf32>
    %131 = arith.addf %117, %125 : vector<2x8x128xf32>
    %132 = arith.addf %118, %130 : vector<8x8x128xf32>
    %133 = vector.shape_cast %131 : vector<2x8x128xf32> to vector<16x128xf32>
    %134 = vector.shape_cast %132 : vector<8x8x128xf32> to vector<64x128xf32>
    %135 = tpu.concatenate %133, %134 in 0 : vector<16x128xf32>, vector<64x128xf32> -> vector<80x128xf32>
    %c240 = arith.constant 240 : index
    %c0_22 = arith.constant 0 : index
    %136 = vector.load %arg3[%c240, %c0_22] : memref<256x128xf32, #tpu.memory_space<vmem>>, vector<16x80xf32>
    %cst_23 = arith.constant dense<0.000000e+00> : vector<16x128xf32>
    %137 = tpu.matmul %136, %135, %cst_23 {dimension_numbers = #tpu.dot_dimension_numbers<[1], [0], [0], [1], [0, 0, 1, 1], [], []>} : vector<16x80xf32>, vector<80x128xf32>, vector<16x128xf32> -> vector<16x128xf32>
    %c16_24 = arith.constant 16 : index
    %c0_25 = arith.constant 0 : index
    %138 = vector.load %arg4[%c16_24, %c0_25] : memref<32x128xf32, #tpu.memory_space<vmem>>, vector<16x128xf32>
    %139 = arith.addf %137, %138 : vector<16x128xf32>
    %c0_26 = arith.constant 0 : index
    %c0_27 = arith.constant 0 : index
    %140 = vector.load %arg5[%c0_26, %c0_27] : memref<16x128xf32, #tpu.memory_space<vmem>>, vector<16x128xf32>
    tpu.vector_store %arg5[%c0_26, %c0_27], %139 {strides = array<i32>} : memref<16x128xf32, #tpu.memory_space<vmem>>, vector<16x128xf32>,
    return
  }
  func.func @transform_0(%arg0: i32) -> (i32, i32) {
    %c0_i32 = arith.constant 0 : i32
    %c0_i32_0 = arith.constant 0 : i32
    return %c0_i32, %arg0 : i32, i32
  }
  func.func @transform_1(%arg0: i32) -> (i32, i32) {
    %c0_i32 = arith.constant 0 : i32
    %c0_i32_0 = arith.constant 0 : i32
    return %c0_i32, %arg0 : i32, i32
  }
  func.func @transform_2(%arg0: i32) -> (i32, i32) {
    %c0_i32 = arith.constant 0 : i32
    %c0_i32_0 = arith.constant 0 : i32
    %c0_i32_1 = arith.constant 0 : i32
    return %c0_i32, %c0_i32_0 : i32, i32
  }
  func.func @transform_3(%arg0: i32) -> (i32, i32) {
    %c0_i32 = arith.constant 0 : i32
    %c0_i32_0 = arith.constant 0 : i32
    %c0_i32_1 = arith.constant 0 : i32
    return %c0_i32, %c0_i32_0 : i32, i32
  }
  func.func @transform_4(%arg0: i32) -> (i32, i32) {
    %c0_i32 = arith.constant 0 : i32
    %c0_i32_0 = arith.constant 0 : i32
    return %c0_i32, %arg0 : i32, i32
  }
}

</mosaic_0001>

<bundles_post_ra>
// kernel: tpu_custom_call.1
= control target key start
LH: loop header
LB: loop body
LE: loop exit
PB: predicated region body
PF: predicated region fallthrough
CT: control target
= control target key end

     0   :  { %s3970_s0 = inlined_call_operand.hbm [shape: f32[32,256], index: 0, kind: input, shape index: {}]   ;;  %s3971_s1 = inlined_call_operand.hbm [shape: f32[64,256], index: 1, kind: input, shape index: {}]   ;;  %s3972_s2 = inlined_call_operand.hbm [shape: f32[256,128], index: 2, kind: input, shape index: {}]   ;;  %s3973_s3 = inlined_call_operand.hbm [shape: f32[32,128], index: 3, kind: input, shape index: {}]   ;;  %s3974_s4 = inlined_call_operand.hbm [shape: f32[16,256], index: 4, kind: output, shape index: {}]  }
   0x1   :  { %3991 = sst [smem:[#allocation41_spill]] %s3970_s0 }
   0x2   :  { %3992 = sst [smem:[#allocation42_spill]] %s3972_s2 }
   0x3   :  { %3993 = sst [smem:[#allocation43_spill]] %s3973_s3 }
   0x4   :  { %9 = vsyncpa [#allocation3], 0 }
   0x5   :  { %11 = vsyncpa [#allocation3 + $0x1], 0 }
   0x6   :  { %12 = vsyncpa [#allocation6], 0 }
   0x7   :  { %14 = vsyncpa [#allocation6 + $0x1], 0 }
   0x8   :  { %15 = vsyncpa [#allocation9], 0 }
   0x9   :  { %16 = vsyncpa [#allocation4], 0 }
   0xa   :  { %18 = vsyncpa [#allocation4 + $0x1], 0  ;;  %s2858_s15 = smov 0   ;;  %s2860_s16 = smov 0  }
   0xb   :  { %s2862_s17 = smov 0   ;;  %s2864_s18 = smov 0  }
   0xc LB: > { %s2879_s19 = sadd.s32 4294967295, %s2816_s18   ;;  %s2143_s20 = sadd.s32 4294967294, %s2816_s18   ;;  %s2816_s18 = sphi %s2864_s18, %s4113_s18   ;;  %s2812_s17 = sphi %s2862_s17, %s4112_s17   ;;  %s2808_s16 = sphi %s2860_s16, %s4111_s16   ;;  %s2804_s15 = sphi %s2858_s15, %s4110_s15  }
   0xd   : > { %s2883_s21 = sadd.s32 1, %s2816_s18   ;;  %s31_s22 = sadd.s32 1, %s2812_s17 }
   0xe   : > { %s28_s23 = ssub.s32 %s2816_s18, %s2883_s21  ;;  %p38_p0 = scmp.ne.s32.totalorder %s2812_s17, %s2808_s16 }
   0xf   : > { %p29_p1 = scmp.eq.s32.totalorder %s28_s23, 0  ;;  %p39_p2 = scmp.eq.s32.totalorder %s2816_s18, 0 }
  0x10   : > { %p44_p3 = scmp.ne.s32.totalorder %s2808_s16, %s2804_s15  ;;  %p3975_p4 = scmp.eq.s32.totalorder %s2879_s19, 0 }
  0x11   : > { %s2895_s24 = scalar_select %p29_p1, %s2812_s17, %s31_s22  }
  0x12   : > { %p2897_p5 = por %p39_p2, %p38_p0  ;;  %p2903_p6 = por %p3975_p4, %p44_p3 }
  0x13   : > { %p136_p7 = scmp.eq.s32.totalorder %s2879_s19, 1  ;;  %p142_p8 = scmp.eq.s32.totalorder %s2143_s20, 1 }
  0x14   : > { %s3994_s25 = scalar_select %p2897_p5, 1, 0 }
  0x15   : > { %s3995_s26 = scalar_select %p2903_p6, 1, 0 }
  0x16   : > { %p2144_p9 = scmp.ge.s32.totalorder %s2816_s18, 1  ;;  %p149_p10 = scmp.lt.s32.totalorder %s2816_s18, 3 }
  0x17   : > { %p2910_p11 = por %p136_p7, %p38_p0  ;;  %p2914_p12 = por %p142_p8, %p44_p3 }
  0x18   : > { %p2918_p13 = pnand %p2144_p9, %p149_p10  ;;  %s2818_s30 = smov [#allocation7]  }
  0x19   : > { %s3996_s27 = scalar_select %p2910_p11, 1, 0 }
  0x1a   : > { %s3997_s28 = scalar_select %p2914_p12, 1, 0 }
  0x1b   : > { %s3998_s29 = scalar_select %p2918_p13, 1, 0 }
  0x1c   : > { %p2502_p1 = pneg %p2918_p13  ;;  %s161_s5 = sshll.u32 %s2818_s30, 4  ;;  %s162_s5 = int_to_ptr.vmem [resolvable:$true] %s161_s5 }
  0x1d   : > { %s2819_s7 = smov [#allocation8]   ;;  %s4000_s2 = sld [smem:[#allocation42_spill]] }
  0x1e   : > { %p2926_p2 = pnand %p2502_p1, %p3975_p4  ;;  %s174_s8 = sshll.u32 %s2819_s7, 4  ;;  %s175_s8 = int_to_ptr.vmem [resolvable:$true] %s174_s8 }
  0x20   : > { %p2624_p8 = pneg %p2926_p2 }
  0x23   : > { %s2622_s11 = scalar_lea.hbm %s4000_s2, 4096 }
  0x24   : > { %p2623_p7 = scmp.ne.s32.totalorder %s4000_s2, %s2622_s11  ;;  %p2629_p1 = scmp.lt.u32.totalorder %s2622_s11, %s4000_s2 }
  0x26   : > { %p2625_p9 = pnand %p2624_p8, %p2623_p7 }
  0x28   : > { %p2626_p10 = pneg %p2625_p9 }
  0x2a   : > { %p2631_p0 = pnand %p2629_p1, %p2626_p10 }
  0x2c   : > { %2634 = shalt.err (!%p2631_p0)
}
  0x2d   : > { %s2635_s22 = scalar_lea.vmem %s162_s5, 4096  ;;  %p2643_p11 = scmp.lt.s32.totalorder %s162_s5, %s162_s5 }
  0x2e   : > { %p2636_p4 = scmp.ne.s32.totalorder %s162_s5, %s2635_s22  ;;  %p2644_p6 = scmp.lt.s32.totalorder %s2635_s22, %s2635_s22 }
  0x30   : > { %p2638_p3 = pnand %p2636_p4, %p2624_p8  ;;  %p2645_p13 = por %p2644_p6, %p2643_p11 }
  0x32   : > { %p2639_p12 = pneg %p2638_p3 }
  0x34   : > { %p2646_p5 = pnand %p2645_p13, %p2639_p12 }
  0x36   : > { %2649 = shalt.err (!%p2646_p5)
}
  0x37   : > { %s2820_s23 = smov 128   ;;  %s2821_s30 = smov 8  }
  0x38   : > { %2505 = dma.hbm_to_vmem [thread:$0]  (!%p2926_p2), %s4000_s2, 4096, %s162_s5, [#allocation6], %s2820_s23, %s2820_s23, %s2821_s30  }
  0x39   : > { %p4001_p4 = scmp.ne.s32.totalorder %s3994_s25, 0  ;;  %p4002_p0 = scmp.lt.s32.totalorder %s2816_s18, 2 }
  0x3a   : > { %s4004_s3 = sld [smem:[#allocation43_spill]] }
  0x3b   : > { %p2961_p3 = pnand %p4002_p0, %p4001_p4 }
  0x3d   : > { %s4003_s10 = scalar_select %p2961_p3, 1, 0 }
  0x40   : > { %s2650_s13 = scalar_lea.hbm %s4004_s3, 512 }
  0x41   : > { %p2651_p5 = scmp.ne.s32.totalorder %s4004_s3, %s2650_s13  ;;  %p2657_p12 = scmp.lt.u32.totalorder %s2650_s13, %s4004_s3 }
  0x43   : > { %p2653_p6 = pnand %p2651_p5, %p2624_p8 }
  0x45   : > { %p2654_p11 = pneg %p2653_p6 }
  0x47   : > { %p2659_p13 = pnand %p2657_p12, %p2654_p11 }
  0x49   : > { %2662 = shalt.err (!%p2659_p13)
}
  0x4a   : > { %s2663_s22 = scalar_lea.vmem %s175_s8, 512  ;;  %p2671_p1 = scmp.lt.s32.totalorder %s175_s8, %s175_s8 }
  0x4b   : > { %p2664_p7 = scmp.ne.s32.totalorder %s175_s8, %s2663_s22  ;;  %p2672_p4 = scmp.lt.s32.totalorder %s2663_s22, %s2663_s22 }
  0x4d   : > { %p2666_p9 = pnand %p2664_p7, %p2624_p8  ;;  %p2673_p0 = por %p2672_p4, %p2671_p1 }
  0x4f   : > { %p2667_p10 = pneg %p2666_p9 }
  0x51   : > { %p2674_p3 = pnand %p2673_p0, %p2667_p10 }
  0x53   : > { %2677 = shalt.err (!%p2674_p3)
}
  0x54   : > { %2508 = dma.hbm_to_vmem [thread:$0]  (!%p2926_p2), %s4004_s3, 512, %s175_s8, [#allocation9], %s2820_s23, %s2820_s23, %s2821_s30  }
  0x55   : > { %s2989_s11 = sand.u32 1, %s2812_s17   ;;  %s3980_s13 = sshll.u32 %s2816_s18, 7 }
  0x56   : > { %s2148_s12 = sshll.u32 %s2989_s11, 5  ;;  %s4005_s0 = sld [smem:[#allocation41_spill]] }
  0x57   : > { %s192_s5 = scalar_lea.vmem [#allocation2], %s2148_s12  ;;  %s189_s8 = scalar_lea.sflag [#allocation3], %s2989_s11 }
  0x58   : > { %s198_s25 = sshll.u32 %s192_s5, 4  ;;  %p4006_p8 = scmp.ne.s32.totalorder %s4003_s10, 0  ;;  %s3000_s25 = int_to_ptr.vmem [resolvable:$true] %s198_s25 }
  0x5a   : > { %p2680_p3 = pneg %p4006_p8 }
  0x5c   : > { %s2998_s20 = scalar_lea.hbm %s4005_s0, %s3980_s13  ;;  %s2683_s6 = scalar_lea.hbm %s4005_s0, 1024 }
  0x5d   : > { %s2678_s22 = scalar_lea.hbm %s2998_s20, 512  ;;  %p2684_p11 = scmp.lt.u32.totalorder %s2998_s20, %s4005_s0 }
  0x5e   : > { %p2679_p2 = scmp.ne.s32.totalorder %s2998_s20, %s2678_s22  ;;  %p2685_p12 = scmp.lt.u32.totalorder %s2683_s6, %s2678_s22 }
  0x5f   : > { %p2687_p7 = scmp.lt.u32.totalorder %s2678_s22, %s2998_s20 }
  0x60   : > { %p2681_p5 = pnand %p2680_p3, %p2679_p2  ;;  %p2686_p13 = por %p2685_p12, %p2684_p11 }
  0x62   : > { %p2682_p6 = pneg %p2681_p5  ;;  %p2688_p9 = por %p2687_p7, %p2686_p13 }
  0x64   : > { %p2689_p10 = pnand %p2688_p9, %p2682_p6 }
  0x66   : > { %2692 = shalt.err (!%p2689_p10)
}
  0x67   : > { %s2693_s12 = scalar_lea.vmem %s3000_s25, 512  ;;  %s2822_s5 = smov [#allocation2]  }
  0x68   : > { %p2694_p1 = scmp.ne.s32.totalorder %s3000_s25, %s2693_s12  ;;  %s2698_s7 = sshll.u32 %s2822_s5, 4  ;;  %s2699_s7 = int_to_ptr.vmem [resolvable:$false] %s2698_s7 }
  0x69   : > { %s2700_s13 = scalar_lea.vmem %s2699_s7, 1024  ;;  %p2701_p2 = scmp.lt.s32.totalorder %s3000_s25, %s2699_s7 }
  0x6a   : > { %p2696_p4 = pnand %p2694_p1, %p2680_p3  ;;  %p2702_p5 = scmp.lt.s32.totalorder %s2700_s13, %s2693_s12 }
  0x6c   : > { %p2697_p0 = pneg %p2696_p4  ;;  %p2703_p11 = por %p2702_p5, %p2701_p2 }
  0x6e   : > { %p2704_p12 = pnand %p2703_p11, %p2697_p0 }
  0x70   : > { %2707 = shalt.err (!%p2704_p12)
}
  0x71   : > { %s2823_s22 = smov 256   ;;  %s208_s9 = sand.u32 1, %s2816_s18  }
  0x72   : > { %2512 = dma.hbm_to_vmem [thread:$0]  (!%p4006_p8), %s2998_s20, 512, %s3000_s25, %s189_s8, %s2823_s22, %s2820_s23, %s2821_s30  }
  0x73   : > { %s4007_s6 = sshll.u32 %s2816_s18, 7  ;;  %s2150_s7 = sshll.u32 %s2989_s11, 6 }
  0x74   : > { %s3039_s5 = scalar_lea.hbm %s3971_s1, %s4007_s6  ;;  %s212_s13 = scalar_lea.vmem [#allocation5], %s2150_s7 }
  0x75   : > { %s218_s0 = sshll.u32 %s212_s13, 4  ;;  %s3044_s2 = scalar_lea.sflag [#allocation6], %s208_s9  ;;  %s3042_s0 = int_to_ptr.vmem [resolvable:$true] %s218_s0 }
  0x76   : > { %s2708_s3 = scalar_lea.hbm %s3039_s5, 1024  ;;  %s2713_s8 = scalar_lea.hbm %s3971_s1, 2048 }
  0x77   : > { %p2709_p6 = scmp.ne.s32.totalorder %s3039_s5, %s2708_s3  ;;  %p2714_p9 = scmp.lt.u32.totalorder %s3039_s5, %s3971_s1 }
  0x78   : > { %p2715_p10 = scmp.lt.u32.totalorder %s2713_s8, %s2708_s3  ;;  %p2717_p4 = scmp.lt.u32.totalorder %s2708_s3, %s3039_s5 }
  0x79   : > { %p2711_p13 = pnand %p2709_p6, %p2680_p3 }
  0x7a   : > { %p2716_p1 = por %p2715_p10, %p2714_p9 }
  0x7b   : > { %p2712_p7 = pneg %p2711_p13 }
  0x7c   : > { %p2718_p0 = por %p2717_p4, %p2716_p1 }
  0x7e   : > { %p2719_p2 = pnand %p2718_p0, %p2712_p7 }
  0x80   : > { %2722 = shalt.err (!%p2719_p2)
}
  0x81   : > { %s2723_s11 = scalar_lea.vmem %s3042_s0, 1024  ;;  %s2824_s9 = smov [#allocation5]  }
  0x82   : > { %p2724_p5 = scmp.ne.s32.totalorder %s3042_s0, %s2723_s11  ;;  %s2728_s12 = sshll.u32 %s2824_s9, 4  ;;  %s2729_s12 = int_to_ptr.vmem [resolvable:$false] %s2728_s12 }
  0x83   : > { %s2730_s7 = scalar_lea.vmem %s2729_s12, 2048  ;;  %p2731_p6 = scmp.lt.s32.totalorder %s3042_s0, %s2729_s12 }
  0x84   : > { %p2726_p11 = pnand %p2724_p5, %p2680_p3  ;;  %p2732_p13 = scmp.lt.s32.totalorder %s2730_s7, %s2723_s11 }
  0x86   : > { %p2727_p12 = pneg %p2726_p11  ;;  %p2733_p9 = por %p2732_p13, %p2731_p6 }
  0x88   : > { %p2734_p10 = pnand %p2733_p9, %p2727_p12 }
  0x8a   : > { %2737 = shalt.err (!%p2734_p10)
}
  0x8b   : > { %2515 = dma.hbm_to_vmem [thread:$0]  (!%p4006_p8), %s3039_s5, 1024, %s3042_s0, %s3044_s2, %s2823_s22, %s2820_s23, %s2821_s30  }
  0x8c   : > { %p4008_p3 = scmp.ne.s32.totalorder %s3998_s29, 0 }
  0x8e   : > { %230 = sbr.rel (%p4008_p3) target bundleno = 1220 (0x4c4), region = 36 }
  0x95   : > { %s3076_s3 = sand.u32 1, %s2808_s16   ;;  %p4009_p7 = scmp.ne.s32.totalorder %s3995_s26, 0 }
  0x96   : > { %s2153_s13 = sshll.u32 %s3076_s3, 5  ;;  %s233_s20 = scalar_lea.sflag [#allocation3], %s3076_s3 }
  0x97   : > { %s236_s25 = scalar_lea.vmem [#allocation2], %s2153_s13 }
  0x98   : > { %2783 = dma.done.wait (%p4009_p7), %s233_s20, 512  }
  0x99   : > { %2785 = vsyncadd (%p4009_p7), %s233_s20, 4294966784  ;;  %s241_s0 = sand.u32 1, %s2879_s19   ;;  %s2154_s2 = sshll.u32 %s3076_s3, 6 }
  0x9a   : > { %s242_s29 = scalar_lea.sflag [#allocation6], %s241_s0  ;;  %s3086_s23 = scalar_lea.vmem [#allocation5], %s2154_s2 }
  0x9b   : > { %2787 = dma.done.wait (%p4009_p7), %s242_s29, 1024  }
  0x9c   : > { %2789 = vsyncadd (%p4009_p7), %s242_s29, 4294966272  ;;  %p4010_p8 = scmp.eq.s32.totalorder %s2879_s19, 0 }
  0x9e   : > { %2791 = dma.done.wait (%p4010_p8), [#allocation6], 4096   ;;  %p4011_p1 = pmov %p4010_p8 }
  0xa0   : > { %2793 = vsyncadd (%p4011_p1), [#allocation6], 4294963200  ;;  %p4012_p4 = pmov %p4011_p1 }
  0xa1   : > { %p4013_p0 = pmov %p4011_p1 }
  0xa2   : > { %2795 = dma.done.wait (%p4012_p4), [#allocation9], 512  }
  0xa3   : > { %2797 = vsyncadd (%p4013_p0), [#allocation9], 4294966784  ;;  %v2825_v0 = vmov 0.0|0.0   ;;  %vm2826_vm0 = vmmov 0   ;;  %v2827_v1 = vmov 0.0   ;;  %v283_v2 = vld [vmem:[%s236_s25] sm:$0xff] }
  0xa4   : > { %2431 = vmatprep.subr.bf16.mxu0 %v2825_v0  ;;  %2290 = vmatprep.mubr.msk.f32.mxu0 %vm2826_vm0, %v2827_v1  ;;  %v284_v3 = vld [vmem:[%s236_s25 + $0x8] sm:$0xff]  ;;  %v285_v4 = vld [vmem:[%s236_s25 + $0x10] sm:$0xff]  ;;  %v286_v6 = vld [vmem:[%s236_s25 + $0x18] sm:$0xff]  ;;  %vm298_vm1 = vcmask 261120   ;;  %vm518_vm13 = vcmask 719872   ;;  %vm739_vm14 = vcmask 588800  }
  0xa5   : > { %2437 = vmatprep.subr.bf16.mxu1 %v2825_v0  ;;  %2345 = vmatprep.mubr.msk.f32.mxu1 %vm2826_vm0, %v2827_v1  ;;  %v2432_v5 = vpack.c.bf16 %v284_v3, %v283_v2  ;;  %v2435_v7 = vpack.c.bf16 %v286_v6, %v285_v4  ;;  %v287_v8 = vld [vmem:[#allocation7] sm:$0xff]  ;;  %v288_v9 = vld [vmem:[#allocation7 + $0x8] sm:$0xff]  ;;  %v289_v10 = vld [vmem:[#allocation7 + $0x10] sm:$0xff]  ;;  %s2157_s26 = sshll.u32 %s3076_s3, 4  ;;  %s2213_s22 = sshll.u32 %s2879_s19, 7 }
  0xa6   : > { %v290_v11 = vld [vmem:[#allocation7 + $0x18] sm:$0xff]  ;;  %v291_v12 = vld [vmem:[#allocation7 + $0x20] sm:$0xff]  ;;  %v292_v13 = vld [vmem:[#allocation7 + $0x28] sm:$0xff]  ;;  %s282_s30 = scalar_lea.vmem [#allocation10], %s2157_s26  ;;  %s3926_s6 = scalar_lea.hbm %s3974_s4, %s2213_s22 }
  0xa7   : > { %2433 = vmatpush3.bf16.msra.mxu0 %v2432_v5  ;;  %v293_v14 = vld [vmem:[#allocation7 + $0x30] sm:$0xff]  ;;  %v294_v15 = vld [vmem:[#allocation7 + $0x38] sm:$0xff]  ;;  %v295_v16 = vld [vmem:[#allocation7 + $0x40] sm:$0xff]  ;;  %s2028_s10 = sshll.u32 %s282_s30, 4  ;;  %s2016_s14 = scalar_lea.sflag [#allocation4], %s3076_s3  ;;  %s3921_s10 = int_to_ptr.vmem [resolvable:$true] %s2028_s10 }
  0xa8   : > { %2434 = vmatprep.subr.bf16.mxu0 %v2825_v0  ;;  %v296_v17 = vld [vmem:[#allocation7 + $0x48] sm:$0xff]  ;;  %v297_v18 = vld [vmem:[#allocation7 + $0x50] sm:$0xff]  ;;  %s2738_s11 = scalar_lea.vmem %s3921_s10, 256  ;;  %p4107_p5 = scmp.ne.s32.totalorder %s3996_s27, 0 }
  0xa9   : > { %p2739_p2 = scmp.ne.s32.totalorder %s3921_s10, %s2738_s11  ;;  %s2829_s19 = smov [#allocation10]  }
  0xaa   : > { %s2742_s9 = sshll.u32 %s2829_s19, 4  ;;  %s2743_s9 = int_to_ptr.vmem [resolvable:$false] %s2742_s9 }
  0xab   : > { %2436 = vmatpush3.bf16.msra.mxu0 %v2435_v7  ;;  %p2740_p11 = pnand %p2739_p2, %p4107_p5  ;;  %s2744_s12 = scalar_lea.vmem %s2743_s9, 512 }
  0xac   : > { %p2745_p6 = scmp.lt.s32.totalorder %s3921_s10, %s2743_s9  ;;  %p2746_p13 = scmp.lt.s32.totalorder %s2744_s12, %s2738_s11 }
  0xad   : > { %p2741_p12 = pneg %p2740_p11 }
  0xae   : > { %2291 = vmatmul.mubr.msk.f32.vlgmr.msra.gmra.mrb[0].mxu0 %vm298_vm1, %v287_v8  ;;  %p2747_p9 = por %p2746_p13, %p2745_p6 }
  0xaf   : > { %2293 = vmatprep.mubr.msk.f32.mxu0 %vm2826_vm0, %v2827_v1 }
  0xb0   : > { %p2748_p10 = pnand %p2747_p9, %p2741_p12 }
  0xb2   : > { %2294 = vmatmul.mubr.msk.f32.gmra.mrb[2].mxu0 %vm298_vm1, %v288_v9 }
  0xb3   : > { %2296 = vmatprep.mubr.msk.f32.mxu0 %vm2826_vm0, %v2827_v1 }
  0xb6   : > { %2297 = vmatmul.mubr.msk.f32.gmra.mrb[4].mxu0 %vm298_vm1, %v289_v10 }
  0xb7   : > { %2299 = vmatprep.mubr.msk.f32.mxu0 %vm2826_vm0, %v2827_v1 }
  0xba   : > { %2300 = vmatmul.mubr.msk.f32.gmra.mrb[6].mxu0 %vm298_vm1, %v290_v11 }
  0xbb   : > { %2302 = vmatprep.mubr.msk.f32.mxu0 %vm2826_vm0, %v2827_v1 }
  0xbe   : > { %2303 = vmatmul.mubr.msk.f32.gmra.mrb[8].mxu0 %vm298_vm1, %v291_v12 }
  0xbf   : > { %2305 = vmatprep.mubr.msk.f32.mxu0 %vm2826_vm0, %v2827_v1 }
  0xc2   : > { %2306 = vmatmul.mubr.msk.f32.gmra.mrb[10].mxu0 %vm298_vm1, %v292_v13 }
  0xc3   : > { %2308 = vmatprep.mubr.msk.f32.mxu0 %vm2826_vm0, %v2827_v1 }
  0xc6   : > { %2309 = vmatmul.mubr.msk.f32.gmra.mrb[12].mxu0 %vm298_vm1, %v293_v14 }
  0xc7   : > { %2311 = vmatprep.mubr.msk.f32.mxu0 %vm2826_vm0, %v2827_v1 }
  0xca   : > { %2312 = vmatmul.mubr.msk.f32.gmra.mrb[14].mxu0 %vm298_vm1, %v294_v15 }
  0xcb   : > { %2314 = vmatprep.mubr.msk.f32.mxu0 %vm2826_vm0, %v2827_v1 }
  0xce   : > { %2315 = vmatmul.mubr.msk.f32.gmra.mrb[16].mxu0 %vm298_vm1, %v295_v16 }
  0xcf   : > { %2317 = vmatprep.mubr.msk.f32.mxu0 %vm2826_vm0, %v2827_v1 }
  0xd2   : > { %2318 = vmatmul.mubr.msk.f32.gmra.mrb[18].mxu0 %vm298_vm1, %v296_v17 }
  0xd3   : > { %2320 = vmatprep.mubr.msk.f32.mxu0 %vm2826_vm0, %v2827_v1 }
  0xd6   : > { %2321 = vmatmul.mubr.msk.f32.gmra.mrb[20].mxu0 %vm298_vm1, %v297_v18 }
 0x181   : > { %v398_v19 = vpop.f32.mrb[0].mxu0 }
 0x182   : > { %v463_v20 = vmul.f32 1.442695, %v398_v19  ;;  %v2292_v21 = vpop.f32.mrb[1].mxu0  ;;  %vm452_vm2 = vcmp.gt.f32.partialorder %v398_v19, 0.0 }
 0x184   : > { %2578 = vpow2.f32 %v463_v20 }
 0x185   : > { %v403_v22 = vpop.f32.mrb[2].mxu0 }
 0x186   : > { %v465_v23 = vmul.f32 1.442695, %v403_v22  ;;  %v2295_v24 = vpop.f32.mrb[3].mxu0  ;;  %vm453_vm3 = vcmp.gt.f32.partialorder %v403_v22, 0.0 }
 0x188   : > { %2580 = vpow2.f32 %v465_v23 }
 0x189   : > { %v408_v25 = vpop.f32.mrb[4].mxu0 }
 0x18a   : > { %v467_v26 = vmul.f32 1.442695, %v408_v25  ;;  %v2298_v27 = vpop.f32.mrb[5].mxu0  ;;  %vm454_vm4 = vcmp.gt.f32.partialorder %v408_v25, 0.0 }
 0x18b   : > { %v507_v27 = vld [vmem:[#allocation7 + $0x58] sm:$0xff] }
 0x18c   : > { %2582 = vpow2.f32 %v467_v26 }
 0x18d   : > { %v413_v28 = vpop.f32.mrb[6].mxu0 }
 0x18e   : > { %v2579_v29 = vpop.eup %2578  ;;  %v469_v30 = vmul.f32 1.442695, %v413_v28  ;;  %v2301_v31 = vpop.f32.mrb[7].mxu0  ;;  %vm455_vm5 = vcmp.gt.f32.partialorder %v413_v28, 0.0 }
 0x18f   : > { %v2169_v32 = vadd.f32 -1.0, %v2579_v29  ;;  %v509_v29 = vld [vmem:[#allocation7 + $0x68] sm:$0xff]  ;;  %v511_v31 = vld [vmem:[#allocation7 + $0x78] sm:$0xff] }
 0x190   : > { %2584 = vpow2.f32 %v469_v30  ;;  %v510_v30 = vld [vmem:[#allocation7 + $0x70] sm:$0xff] }
 0x191   : > { %v418_v33 = vpop.f32.mrb[8].mxu0  ;;  %v496_v39 = vsel %vm452_vm2, %v398_v19, %v2169_v32  ;;  %v512_v32 = vld [vmem:[#allocation7 + $0x80] sm:$0xff] }
 0x192   : > { %v2581_v34 = vpop.eup %2580  ;;  %v471_v35 = vmul.f32 1.442695, %v418_v33  ;;  %v2304_v36 = vpop.f32.mrb[9].mxu0  ;;  %vm456_vm6 = vcmp.gt.f32.partialorder %v418_v33, 0.0 }
 0x193   : > { %v2170_v37 = vadd.f32 -1.0, %v2581_v34  ;;  %v514_v34 = vld [vmem:[#allocation7 + $0x90] sm:$0xff]  ;;  %v516_v36 = vld [vmem:[#allocation7 + $0xa0] sm:$0xff] }
 0x194   : > { %2586 = vpow2.f32 %v471_v35  ;;  %v515_v35 = vld [vmem:[#allocation7 + $0x98] sm:$0xff] }
 0x195   : > { %v423_v38 = vpop.f32.mrb[10].mxu0  ;;  %v497_v40 = vsel %vm453_vm3, %v403_v22, %v2170_v37  ;;  %v517_v37 = vld [vmem:[#allocation7 + $0xa8] sm:$0xff] }
 0x196   : > { %v2583_v41 = vpop.eup %2582  ;;  %v473_v42 = vmul.f32 1.442695, %v423_v38  ;;  %v2307_v43 = vpop.f32.mrb[11].mxu0  ;;  %v2438_v44 = vpack.c.bf16 %v497_v40, %v496_v39  ;;  %vm457_vm7 = vcmp.gt.f32.partialorder %v423_v38, 0.0 }
 0x197   : > { %v2171_v45 = vadd.f32 -1.0, %v2583_v41 }
 0x198   : > { %2588 = vpow2.f32 %v473_v42  ;;  %2439 = vmatpush3.bf16.msra.mxu1 %v2438_v44 }
 0x199   : > { %v428_v46 = vpop.f32.mrb[12].mxu0  ;;  %2440 = vmatprep.subr.bf16.mxu1 %v2825_v0  ;;  %v498_v51 = vsel %vm454_vm4, %v408_v25, %v2171_v45 }
 0x19a   : > { %v2585_v47 = vpop.eup %2584  ;;  %v475_v48 = vmul.f32 1.442695, %v428_v46  ;;  %v2310_v49 = vpop.f32.mrb[13].mxu0  ;;  %vm458_vm8 = vcmp.gt.f32.partialorder %v428_v46, 0.0 }
 0x19b   : > { %v2172_v50 = vadd.f32 -1.0, %v2585_v47 }
 0x19c   : > { %2590 = vpow2.f32 %v475_v48 }
 0x19d   : > { %v499_v52 = vsel %vm455_vm5, %v413_v28, %v2172_v50  ;;  %v433_v53 = vpop.f32.mrb[14].mxu0 }
 0x19e   : > { %v2587_v54 = vpop.eup %2586  ;;  %v477_v55 = vmul.f32 1.442695, %v433_v53  ;;  %v2313_v56 = vpop.f32.mrb[15].mxu0  ;;  %v2441_v57 = vpack.c.bf16 %v499_v52, %v498_v51  ;;  %vm459_vm9 = vcmp.gt.f32.partialorder %v433_v53, 0.0 }
 0x19f   : > { %v2173_v58 = vadd.f32 -1.0, %v2587_v54 }
 0x1a0   : > { %2592 = vpow2.f32 %v477_v55  ;;  %2442 = vmatpush3.bf16.msra.mxu1 %v2441_v57 }
 0x1a1   : > { %v438_v59 = vpop.f32.mrb[16].mxu0  ;;  %2443 = vmatprep.subr.bf16.mxu1 %v2825_v0  ;;  %v500_v2 = vsel %vm456_vm6, %v418_v33, %v2173_v58  ;;  %v513_v33 = vld [vmem:[#allocation7 + $0x88] sm:$0xff] }
 0x1a2   : > { %v2589_v60 = vpop.eup %2588  ;;  %v479_v61 = vmul.f32 1.442695, %v438_v59  ;;  %v2316_v62 = vpop.f32.mrb[17].mxu0  ;;  %vm460_vm10 = vcmp.gt.f32.partialorder %v438_v59, 0.0 }
 0x1a3   : > { %v2174_v63 = vadd.f32 -1.0, %v2589_v60 }
 0x1a4   : > { %2594 = vpow2.f32 %v479_v61 }
 0x1a5   : > { %v501_v3 = vsel %vm457_vm7, %v423_v38, %v2174_v63  ;;  %v443_v4 = vpop.f32.mrb[18].mxu0  ;;  %v731_v38 = vld [vmem:[#allocation7 + $0xb0] sm:$0xff] }
 0x1a6   : > { %v2591_v5 = vpop.eup %2590  ;;  %v481_v6 = vmul.f32 1.442695, %v443_v4  ;;  %v2319_v7 = vpop.f32.mrb[19].mxu0  ;;  %v2444_v8 = vpack.c.bf16 %v501_v3, %v500_v2  ;;  %vm461_vm11 = vcmp.gt.f32.partialorder %v443_v4, 0.0  ;;  %2396 = vmatprep.mubr.msk.f32.mxu0 %vm739_vm14, %v731_v38  ;;  %v733_v38 = vld [vmem:[#allocation7 + $0xc0] sm:$0xff] }
 0x1a7   : > { %v2175_v9 = vadd.f32 -1.0, %v2591_v5 }
 0x1a8   : > { %2596 = vpow2.f32 %v481_v6  ;;  %2445 = vmatpush3.bf16.msra.mxu1 %v2444_v8 }
 0x1a9   : > { %v448_v10 = vpop.f32.mrb[20].mxu0  ;;  %2446 = vmatprep.subr.bf16.mxu1 %v2825_v0  ;;  %v502_v15 = vsel %vm458_vm8, %v428_v46, %v2175_v9  ;;  %vm1931_vm8 = vcmask 654336  }
 0x1aa   : > { %v2593_v11 = vpop.eup %2592  ;;  %v483_v12 = vmul.f32 1.442695, %v448_v10  ;;  %v2322_v13 = vpop.f32.mrb[21].mxu0  ;;  %vm462_vm12 = vcmp.gt.f32.partialorder %v448_v10, 0.0 }
 0x1ab   : > { %v2176_v14 = vadd.f32 -1.0, %v2593_v11 }
 0x1ac   : > { %2598 = vpow2.f32 %v483_v12 }
 0x1ad   : > { %v503_v16 = vsel %vm459_vm9, %v433_v53, %v2176_v14 }
 0x1ae   : > { %v2595_v17 = vpop.eup %2594  ;;  %v2447_v18 = vpack.c.bf16 %v503_v16, %v502_v15 }
 0x1af   : > { %v2177_v19 = vadd.f32 -1.0, %v2595_v17 }
 0x1b0   : > { %2448 = vmatpush3.bf16.msra.mxu1 %v2447_v18 }
 0x1b1   : > { %2449 = vmatprep.subr.bf16.mxu1 %v2825_v0  ;;  %v504_v22 = vsel %vm460_vm10, %v438_v59, %v2177_v19  ;;  %v508_v0 = vld [vmem:[#allocation7 + $0x60] sm:$0xff] }
 0x1b2   : > { %v2597_v20 = vpop.eup %2596 }
 0x1b3   : > { %v2178_v21 = vadd.f32 -1.0, %v2597_v20 }
 0x1b5   : > { %v505_v23 = vsel %vm461_vm11, %v443_v4, %v2178_v21 }
 0x1b6   : > { %v2599_v24 = vpop.eup %2598  ;;  %v2450_v25 = vpack.c.bf16 %v505_v23, %v504_v22 }
 0x1b7   : > { %v2179_v26 = vadd.f32 -1.0, %v2599_v24 }
 0x1b8   : > { %2451 = vmatpush3.bf16.msra.mxu1 %v2450_v25 }
 0x1b9   : > { %2343 = vmatprep.subr.mxu1 %v2827_v1  ;;  %v506_v28 = vsel %vm462_vm12, %v448_v10, %v2179_v26 }
 0x1bc   : > { %2344 = vmatpush3.msra.mxu1 %v506_v28 }
 0x1bd   : > { %2346 = vmatmul.mubr.msk.f32.vlgmr.msra.gmra.mrb[0].mxu1 %vm518_vm13, %v507_v27 }
 0x1be   : > { %2348 = vmatprep.mubr.msk.f32.mxu1 %vm2826_vm0, %v2827_v1 }
 0x1c1   : > { %2349 = vmatmul.mubr.msk.f32.gmra.mrb[2].mxu1 %vm518_vm13, %v508_v0 }
 0x1c2   : > { %2351 = vmatprep.mubr.msk.f32.mxu1 %vm2826_vm0, %v2827_v1 }
 0x1c5   : > { %2352 = vmatmul.mubr.msk.f32.gmra.mrb[4].mxu1 %vm518_vm13, %v509_v29 }
 0x1c6   : > { %2354 = vmatprep.mubr.msk.f32.mxu1 %vm2826_vm0, %v2827_v1 }
 0x1c9   : > { %2355 = vmatmul.mubr.msk.f32.gmra.mrb[6].mxu1 %vm518_vm13, %v510_v30 }
 0x1ca   : > { %2357 = vmatprep.mubr.msk.f32.mxu1 %vm2826_vm0, %v2827_v1 }
 0x1cd   : > { %2358 = vmatmul.mubr.msk.f32.gmra.mrb[8].mxu1 %vm518_vm13, %v511_v31 }
 0x1ce   : > { %2360 = vmatprep.mubr.msk.f32.mxu1 %vm2826_vm0, %v2827_v1 }
 0x1d1   : > { %2361 = vmatmul.mubr.msk.f32.gmra.mrb[10].mxu1 %vm518_vm13, %v512_v32 }
 0x1d2   : > { %2363 = vmatprep.mubr.msk.f32.mxu1 %vm2826_vm0, %v2827_v1 }
 0x1d5   : > { %2364 = vmatmul.mubr.msk.f32.gmra.mrb[12].mxu1 %vm518_vm13, %v513_v33 }
 0x1d6   : > { %2366 = vmatprep.mubr.msk.f32.mxu1 %vm2826_vm0, %v2827_v1 }
 0x1d9   : > { %2367 = vmatmul.mubr.msk.f32.gmra.mrb[14].mxu1 %vm518_vm13, %v514_v34 }
 0x1da   : > { %2369 = vmatprep.mubr.msk.f32.mxu1 %vm2826_vm0, %v2827_v1 }
 0x1dd   : > { %2370 = vmatmul.mubr.msk.f32.gmra.mrb[16].mxu1 %vm518_vm13, %v515_v35 }
 0x1de   : > { %2372 = vmatprep.mubr.msk.f32.mxu1 %vm2826_vm0, %v2827_v1 }
 0x1e1   : > { %2373 = vmatmul.mubr.msk.f32.gmra.mrb[18].mxu1 %vm518_vm13, %v516_v36 }
 0x1e2   : > { %2375 = vmatprep.mubr.msk.f32.mxu1 %vm2826_vm0, %v2827_v1 }
 0x1e5   : > { %2376 = vmatmul.mubr.msk.f32.gmra.mrb[20].mxu1 %vm518_vm13, %v517_v37  ;;  %v732_v37 = vld [vmem:[#allocation7 + $0xb8] sm:$0xff] }
 0x290   : > { %v3175_v39 = vpop.f32.mrb[0].mxu1 }
 0x291   : > { %v2347_v40 = vpop.f32.mrb[1].mxu1  ;;  %vm672_vm9 = vcmp.gt.f32.partialorder %v3175_v39, 0.0 }
 0x292   : > { %v734_v40 = vld [vmem:[#allocation7 + $0xc8] sm:$0xff] }
 0x294   : > { %v3177_v41 = vpop.f32.mrb[2].mxu1 }
 0x295   : > { %v2350_v42 = vpop.f32.mrb[3].mxu1  ;;  %vm673_vm10 = vcmp.gt.f32.partialorder %v3177_v41, 0.0 }
 0x296   : > { %v735_v42 = vld [vmem:[#allocation7 + $0xd0] sm:$0xff] }
 0x298   : > { %v628_v43 = vpop.f32.mrb[4].mxu1 }
 0x299   : > { %v2353_v44 = vpop.f32.mrb[5].mxu1  ;;  %v687_v45 = vmul.f32 1.442695, %v628_v43  ;;  %vm674_vm0 = vcmp.gt.f32.partialorder %v628_v43, 0.0 }
 0x29a   : > { %v737_v44 = vld [vmem:[#allocation7 + $0xe0] sm:$0xff] }
 0x29b   : > { %2600 = vpow2.f32 %v687_v45  ;;  %v738_v45 = vld [vmem:[#allocation7 + $0xe8] sm:$0xff] }
 0x29c   : > { %v633_v46 = vpop.f32.mrb[6].mxu1 }
 0x29d   : > { %v689_v47 = vmul.f32 1.442695, %v633_v46  ;;  %v2356_v48 = vpop.f32.mrb[7].mxu1  ;;  %vm675_vm15 = vcmp.gt.f32.partialorder %v633_v46, 0.0 }
 0x29e   : > { %v1927_v48 = vld [vmem:[#allocation7 + $0xf0] sm:$0xff] }
 0x29f   : > { %2602 = vpow2.f32 %v689_v47  ;;  %v685_v47 = vmul.f32 1.442695, %v3177_v41  ;;  %2428 = vmatprep.mubr.msk.f32.mxu1 %vm1931_vm8, %v1927_v48 }
 0x2a0   : > { %v638_v1 = vpop.f32.mrb[8].mxu1 }
 0x2a1   : > { %v2359_v49 = vpop.f32.mrb[9].mxu1  ;;  %v691_v52 = vmul.f32 1.442695, %v638_v1  ;;  %vm676_vm1 = vcmp.gt.f32.partialorder %v638_v1, 0.0 }
 0x2a3   : > { %2604 = vpow2.f32 %v691_v52  ;;  %v873_v52 = vlaneseq }
 0x2a4   : > { %v643_v50 = vpop.f32.mrb[10].mxu1 }
 0x2a5   : > { %v2362_v51 = vpop.f32.mrb[11].mxu1  ;;  %v2601_v54 = vpop.eup %2600  ;;  %v693_v57 = vmul.f32 1.442695, %v643_v50  ;;  %vm677_vm2 = vcmp.gt.f32.partialorder %v643_v50, 0.0 }
 0x2a6   : > { %v2193_v58 = vadd.f32 -1.0, %v2601_v54 }
 0x2a7   : > { %2606 = vpow2.f32 %v693_v57  ;;  %v874_v57 = vshrl.u32 %v873_v52, 7 }
 0x2a8   : > { %v648_v53 = vpop.f32.mrb[12].mxu1  ;;  %v718_v63 = vsel %vm674_vm0, %v628_v43, %v2193_v58  ;;  %v736_v43 = vld [vmem:[#allocation7 + $0xd8] sm:$0xff] }
 0x2a9   : > { %v2365_v55 = vpop.f32.mrb[13].mxu1  ;;  %v2603_v56 = vpop.eup %2602  ;;  %v695_v2 = vmul.f32 1.442695, %v648_v53  ;;  %vm678_vm3 = vcmp.gt.f32.partialorder %v648_v53, 0.0 }
 0x2aa   : > { %v2194_v60 = vadd.f32 -1.0, %v2603_v56  ;;  %v727_v55 = vld [vmem:[#allocation8] sm:$0xff] }
 0x2ab   : > { %2608 = vpow2.f32 %v695_v2 }
 0x2ac   : > { %v653_v59 = vpop.f32.mrb[14].mxu1  ;;  %v719_v62 = vsel %vm675_vm15, %v633_v46, %v2194_v60  ;;  %v683_v46 = vmul.f32 1.442695, %v3175_v39 }
 0x2ad   : > { %v2368_v61 = vpop.f32.mrb[15].mxu1  ;;  %v697_v3 = vmul.f32 1.442695, %v653_v59  ;;  %v2452_v5 = vpack.c.bf16 %v719_v62, %v718_v63  ;;  %v2605_v9 = vpop.eup %2604  ;;  %vm679_vm4 = vcmp.gt.f32.partialorder %v653_v59, 0.0  ;;  %v728_v62 = vld [vmem:[#allocation8 + $0x8] sm:$0xff] }
 0x2ae   : > { %v2195_v12 = vadd.f32 -1.0, %v2605_v9 }
 0x2af   : > { %2610 = vpow2.f32 %v697_v3  ;;  %2453 = vmatprep.subr.bf16.mxu0 %v2452_v5 }
 0x2b0   : > { %v658_v4 = vpop.f32.mrb[16].mxu1  ;;  %2455 = vmatpush3.bf16.msra.mxu0 %v2452_v5  ;;  %v720_v19 = vsel %vm676_vm1, %v638_v1, %v2195_v12 }
 0x2b1   : > { %v699_v6 = vmul.f32 1.442695, %v658_v4  ;;  %v2371_v7 = vpop.f32.mrb[17].mxu1  ;;  %v2607_v14 = vpop.eup %2606  ;;  %vm680_vm5 = vcmp.gt.f32.partialorder %v658_v4, 0.0 }
 0x2b2   : > { %v2196_v17 = vadd.f32 -1.0, %v2607_v14 }
 0x2b3   : > { %2612 = vpow2.f32 %v699_v6 }
 0x2b4   : > { %v663_v8 = vpop.f32.mrb[18].mxu1  ;;  %v721_v20 = vsel %vm677_vm2, %v643_v50, %v2196_v17  ;;  %v2828_v50 = vmov 1966171168  }
 0x2b5   : > { %v701_v10 = vmul.f32 1.442695, %v663_v8  ;;  %v2374_v11 = vpop.f32.mrb[19].mxu1  ;;  %v2609_v18 = vpop.eup %2608  ;;  %v2456_v23 = vpack.c.bf16 %v721_v20, %v720_v19  ;;  %vm681_vm6 = vcmp.gt.f32.partialorder %v663_v8, 0.0  ;;  %v871_v51 = vunpack.c.l.s4 %v2828_v50  ;;  %v3220_v19 = vld [vmem:[%s3086_s23 + $0x8] sm:$0xff] }
 0x2b6   : > { %v2197_v22 = vadd.f32 -1.0, %v2609_v18  ;;  %v3205_v11 = vsub.s32 0, %v874_v57 }
 0x2b7   : > { %2614 = vpow2.f32 %v701_v10  ;;  %2457 = vmatprep.subr.bf16.mxu0 %v2456_v23  ;;  %v872_v56 = vunpack.c.0.s8 %v871_v51 }
 0x2b8   : > { %v668_v13 = vpop.f32.mrb[20].mxu1  ;;  %v722_v26 = vsel %vm678_vm3, %v648_v53, %v2197_v22  ;;  %2459 = vmatpush3.bf16.msra.mxu0 %v2456_v23 }
 0x2b9   : > { %v703_v15 = vmul.f32 1.442695, %v668_v13  ;;  %v2377_v16 = vpop.f32.mrb[21].mxu1  ;;  %v2611_v21 = vpop.eup %2610  ;;  %vm682_vm7 = vcmp.gt.f32.partialorder %v668_v13, 0.0  ;;  %v3192_v60 = vsub.s32 %v872_v56, %v874_v57 }
 0x2ba   : > { %v2198_v25 = vadd.f32 -1.0, %v2611_v21  ;;  %v904_v16 = vld [vmem:[%s3086_s23] sm:$0xff] }
 0x2bb   : > { %2616 = vpow2.f32 %v703_v15  ;;  %v913_v18 = vrot.slane %v904_v16, %v3192_v60  ;;  %v1026_v22 = vrot.slane %v3220_v19, %v3192_v60 }
 0x2bc   : > { %v723_v27 = vsel %vm679_vm4, %v653_v59, %v2198_v25  ;;  %2618 = vpow2.f32 %v683_v46 }
 0x2bd   : > { %v2613_v24 = vpop.eup %2612  ;;  %v2460_v29 = vpack.c.bf16 %v723_v27, %v722_v26  ;;  %2620 = vpow2.f32 %v685_v47  ;;  %v3281_v48 = vrot.slane %v1026_v22, %v3192_v60 }
 0x2be   : > { %v2199_v28 = vadd.f32 -1.0, %v2613_v24 }
 0x2bf   : > { %2461 = vmatprep.subr.bf16.mxu0 %v2460_v29 }
 0x2c0   : > { %v724_v31 = vsel %vm680_vm5, %v658_v4, %v2199_v28  ;;  %2463 = vmatpush3.bf16.msra.mxu0 %v2460_v29  ;;  %v3248_v29 = vld [vmem:[%s3086_s23 + $0x10] sm:$0xff] }
 0x2c1   : > { %v2615_v0 = vpop.eup %2614 }
 0x2c2   : > { %v2200_v30 = vadd.f32 -1.0, %v2615_v0 }
 0x2c4   : > { %v725_v32 = vsel %vm681_vm6, %v663_v8, %v2200_v30 }
 0x2c5   : > { %v2617_v33 = vpop.eup %2616  ;;  %v2464_v34 = vpack.c.bf16 %v725_v32, %v724_v31  ;;  %v921_v32 = vcombine.high %v913_v18, %v913_v18 }
 0x2c6   : > { %v2201_v35 = vadd.f32 -1.0, %v2617_v33  ;;  %v2619_v1 = vpop.eup %2618  ;;  %v1170_v33 = vrot.slane %v3248_v29, %v3192_v60 }
 0x2c7   : > { %2465 = vmatprep.subr.bf16.mxu0 %v2464_v34  ;;  %v2191_v49 = vadd.f32 -1.0, %v2619_v1  ;;  %v2621_v53 = vpop.eup %2620  ;;  %v3289_v50 = vrot.slane %v921_v32, %v3192_v60 }
 0x2c8   : > { %2467 = vmatpush3.bf16.msra.mxu0 %v2464_v34  ;;  %v726_v36 = vsel %vm682_vm7, %v668_v13, %v2201_v35  ;;  %v2192_v58 = vadd.f32 -1.0, %v2621_v53  ;;  %v1178_v51 = vcombine.high %v1170_v33, %v1170_v33 }
 0x2c9   : > { %2394 = vmatprep.subr.mxu0 %v726_v36  ;;  %v716_v54 = vsel %vm672_vm9, %v3175_v39, %v2191_v49  ;;  %v3286_v49 = vrot.slane %v913_v18, %v3192_v60 }
 0x2ca   : > { %v729_v59 = vadd.f32 %v727_v55, %v716_v54  ;;  %v717_v61 = vsel %vm673_vm10, %v3177_v41, %v2192_v58 }
 0x2cb   : > { %v730_v2 = vadd.f32 %v728_v62, %v717_v61  ;;  %v3311_v61 = vld [vmem:[%s3086_s23 + $0x20] sm:$0xff]  ;;  %v3314_v62 = vld [vmem:[%s3086_s23 + $0x28] sm:$0xff] }
 0x2cc   : > { %2395 = vmatpush3.msra.mxu0 %v726_v36  ;;  %v1126_v63 = vcombine.high %v729_v59, %v729_v59  ;;  %v876_v3 = vrot.slane %v729_v59, %v3192_v60  ;;  %v1034_v36 = vcombine.high %v1026_v22, %v1026_v22 }
 0x2cd   : > { %2397 = vmatmul.mubr.msk.f32.vlgmr.msra.gmra.mrb[22].mxu0 %vm739_vm14, %v732_v37  ;;  %v1660_v39 = vcombine.high %v730_v2, %v730_v2  ;;  %v1400_v6 = vrot.slane %v730_v2, %v3192_v60  ;;  %v3262_v37 = vld [vmem:[%s3086_s23 + $0x18] sm:$0xff]  ;;  %v1437_v2 = vrot.slane %v3311_v61, %v3192_v60 }
 0x2ce   : > { %2399 = vmatprep.mubr.msk.f32.mxu0 %vm739_vm14, %v733_v38  ;;  %v1133_v4 = vrot.slane %v1126_v63, %v3192_v60  ;;  %v877_v5 = vcombine.high %v876_v3, %v876_v3  ;;  %v3199_v7 = vrot.slane %v876_v3, %v3192_v60  ;;  %v906_v38 = vcombine.high %v904_v16, %v904_v16 }
 0x2cf   : > { %v1667_v9 = vrot.slane %v1660_v39, %v3192_v60  ;;  %v1401_v10 = vcombine.high %v1400_v6, %v1400_v6  ;;  %v3223_v20 = vrot.slane %v1400_v6, %v3192_v60  ;;  %v3298_v54 = vrot.slane %v1034_v36, %v3192_v60 }
 0x2d0   : > { %v1134_v8 = vcombine.high %v1133_v4, %v1133_v4  ;;  %v3203_v41 = vrot.slane %v877_v5, %v3192_v60  ;;  %v3208_v12 = vrot.slane %v1133_v4, %v3192_v60  ;;  %v1003_v13 = vcombine.high %v3199_v7, %v3199_v7 }
 0x2d1   : > { %2400 = vmatmul.mubr.msk.f32.gmra.mrb[24].mxu0 %vm739_vm14, %v734_v40  ;;  %v1668_v15 = vcombine.high %v1667_v9, %v1667_v9  ;;  %v3226_v21 = vrot.slane %v1401_v10, %v3192_v60  ;;  %v3235_v25 = vrot.slane %v1667_v9, %v3192_v60  ;;  %v1537_v34 = vcombine.high %v3223_v20, %v3223_v20 }
 0x2d2   : > { %2402 = vmatprep.mubr.msk.f32.mxu0 %vm739_vm14, %v735_v42  ;;  %v3213_v14 = vrot.slane %v1134_v8, %v3192_v60  ;;  %v1004_v17 = vcombine.high %v3203_v41, %v3203_v41  ;;  %v1270_v24 = vcombine.high %v3208_v12, %v3208_v12  ;;  %v3240_v27 = vrot.slane %v1003_v13, %v3205_v11  ;;  %v3340_v13 = vld [vmem:[%s3086_s23 + $0x30] sm:$0xff] }
 0x2d3   : > { %v3245_v0 = vrot.slane %v1668_v15, %v3192_v60  ;;  %v1538_v35 = vcombine.high %v3226_v21, %v3226_v21  ;;  %v3292_v52 = vrot.slane %v1537_v34, %v3205_v11  ;;  %v3301_v55 = vrot.slane %v906_v38, %v3192_v60  ;;  %v3343_v15 = vld [vmem:[%s3086_s23 + $0x38] sm:$0xff] }
 0x2d4   : > { %v1271_v28 = vcombine.high %v3213_v14, %v3213_v14  ;;  %v3251_v30 = vrot.slane %v1004_v17, %v3205_v11  ;;  %v3267_v42 = vrot.slane %v1270_v24, %v3205_v11  ;;  %v1560_v3 = vrot.slane %v3314_v62, %v3192_v60 }
 0x2d5   : > { %2403 = vmatmul.mubr.msk.f32.gmra.mrb[26].mxu0 %vm739_vm14, %v736_v43  ;;  %v1804_v43 = vcombine.high %v3235_v25, %v3235_v25  ;;  %v1805_v47 = vcombine.high %v3245_v0, %v3245_v0  ;;  %v3295_v53 = vrot.slane %v1538_v35, %v3205_v11  ;;  %v1064_v4 = vcombine.high %v3281_v48, %v3281_v48 }
 0x2d6   : > { %2405 = vmatprep.mubr.msk.f32.mxu0 %vm739_vm14, %v737_v44  ;;  %v1293_v44 = vrot.slane %v3262_v37, %v3192_v60  ;;  %v3326_v39 = vrot.slane %v1170_v33, %v3192_v60  ;;  %v3329_v5 = vrot.slane %v1178_v51, %v3192_v60  ;;  %v951_v6 = vcombine.high %v3286_v49, %v3286_v49 }
 0x2d7   : > { %v3308_v58 = vrot.slane %v1804_v43, %v3205_v11  ;;  %v3317_v63 = vrot.slane %v1805_v47, %v3205_v11  ;;  %v953_v8 = vcombine.high %v3289_v50, %v3289_v50  ;;  %v1066_v16 = vcombine.high %v3298_v54, %v3298_v54 }
 0x2d8   : > { %v1301_v59 = vcombine.high %v1293_v44, %v1293_v44  ;;  %v922_v17 = vcombine.high %v3301_v55, %v3301_v55  ;;  %v3350_v18 = vrot.slane %v1293_v44, %v3192_v60  ;;  %v1704_v24 = vrot.slane %v3340_v13, %v3192_v60 }
 0x2d9   : > { %2406 = vmatmul.mubr.msk.f32.gmra.mrb[28].mxu0 %vm739_vm14, %v738_v45  ;;  %v3274_v45 = vrot.slane %v1271_v28, %v3205_v11  ;;  %v1827_v28 = vrot.slane %v3343_v15, %v3192_v60  ;;  %v1445_v34 = vcombine.high %v1437_v2, %v1437_v2  ;;  %v1568_v35 = vcombine.high %v1560_v3, %v1560_v3 }
 0x2da   : > { %v3353_v22 = vrot.slane %v1301_v59, %v3192_v60  ;;  %v3364_v36 = vrot.slane %v951_v6, %v3205_v11  ;;  %v3367_v38 = vrot.slane %v953_v8, %v3205_v11  ;;  %v1208_v43 = vcombine.high %v3326_v39, %v3326_v39 }
 0x2db   : > { %v1210_v44 = vcombine.high %v3329_v5, %v3329_v5  ;;  %v3378_v59 = vrot.slane %v1064_v4, %v3205_v11  ;;  %v3381_v6 = vrot.slane %v1066_v16, %v3205_v11  ;;  %v3386_v57 = vrot.slane %v1437_v2, %v3192_v60 }
 0x2dc   : > { %v1712_v56 = vcombine.high %v1704_v24, %v1704_v24  ;;  %v1835_v1 = vcombine.high %v1827_v28, %v1827_v28  ;;  %v3389_v46 = vrot.slane %v1445_v34, %v3192_v60  ;;  %v3392_v40 = vrot.slane %v1560_v3, %v3192_v60 }
 0x2dd   : > { %v3395_v4 = vrot.slane %v1568_v35, %v3192_v60  ;;  %v1331_v16 = vcombine.high %v3350_v18, %v3350_v18  ;;  %v3402_v2 = vrot.slane %v1208_v43, %v3205_v11  ;;  %v3405_v31 = vrot.slane %v1210_v44, %v3205_v11 }
 0x2de   : > { %v1333_v34 = vcombine.high %v3353_v22, %v3353_v22  ;;  %v3418_v43 = vrot.slane %v1704_v24, %v3192_v60  ;;  %v3421_v44 = vrot.slane %v1712_v56, %v3192_v60  ;;  %v3424_v47 = vrot.slane %v1827_v28, %v3192_v60 }
 0x2df   : > { %v3427_v3 = vrot.slane %v1835_v1, %v3192_v60  ;;  %v3430_v35 = vrot.slane %v1331_v16, %v3205_v11  ;;  %v1475_v51 = vcombine.high %v3386_v57, %v3386_v57  ;;  %v1019_v8 = vcombine.high %v3220_v19, %v3220_v19 }
 0x2e0   : > { %v1163_v24 = vcombine.high %v3248_v29, %v3248_v29  ;;  %v3439_v56 = vrot.slane %v1333_v34, %v3205_v11  ;;  %v1477_v28 = vcombine.high %v3389_v46, %v3389_v46  ;;  %v1598_v1 = vcombine.high %v3392_v40, %v3392_v40 }
 0x2e1   : > { %v1286_v16 = vcombine.high %v3262_v37, %v3262_v37  ;;  %v1600_v29 = vcombine.high %v3395_v4, %v3395_v4  ;;  %v1430_v34 = vcombine.high %v3311_v61, %v3311_v61  ;;  %v3461_v37 = vrot.slane %v3301_v55, %v3192_v60 }
 0x2e2   : > { %4014 = vst [vmem:[#allocation16_spill] sm:$0xff] %v3439_v56  ;;  %v3464_v33 = vrot.slane %v922_v17, %v3192_v60  ;;  %v3467_v19 = vrot.slane %v1475_v51, %v3205_v11  ;;  %v1865_v23 = vcombine.high %v3424_v47, %v3424_v47  ;;  %v1033_v61 = vrot.slane %v1019_v8, %v3192_v60 }
 0x2e3   : > { %4015 = vst [vmem:[#allocation17_spill] sm:$0xff] %v3461_v37  ;;  %v1177_v32 = vrot.slane %v1163_v24, %v3192_v60  ;;  %v1867_v26 = vcombine.high %v3427_v3, %v3427_v3  ;;  %v1300_v10 = vrot.slane %v1286_v16, %v3192_v60  ;;  %v1553_v55 = vcombine.high %v3314_v62, %v3314_v62 }
 0x2e4   : > { %4016 = vst [vmem:[#allocation18_spill] sm:$0xff] %v3464_v33  ;;  %4017 = vst [vmem:[#allocation19_spill] sm:$0xff] %v3467_v19  ;;  %v1697_v17 = vcombine.high %v3340_v13, %v3340_v13  ;;  %v3481_v51 = vrot.slane %v1477_v28, %v3205_v11  ;;  %v1742_v9 = vcombine.high %v3418_v43, %v3418_v43 }
 0x2e5   : > { %v1744_v8 = vcombine.high %v3421_v44, %v3421_v44  ;;  %v1444_v24 = vrot.slane %v1430_v34, %v3192_v60  ;;  %v3489_v19 = vrot.slane %v1598_v1, %v3205_v11  ;;  %v3492_v16 = vrot.slane %v1600_v29, %v3205_v11 }
 0x2e6   : > { %4018 = vst [vmem:[#allocation20_spill] sm:$0xff] %v3481_v51  ;;  %v1820_v13 = vcombine.high %v3343_v15, %v3343_v15  ;;  %v3499_v28 = vrot.slane %v1865_v23, %v3205_v11  ;;  %v1035_v56 = vcombine.high %v1033_v61, %v1033_v61  ;;  %v1179_v34 = vcombine.high %v1177_v32, %v1177_v32 }
 0x2e7   : > { %4019 = vst [vmem:[#allocation21_spill] sm:$0xff] %v3489_v19  ;;  %4020 = vst [vmem:[#allocation22_spill] sm:$0xff] %v3492_v16  ;;  %v3504_v1 = vrot.slane %v1867_v26, %v3205_v11  ;;  %v1302_v19 = vcombine.high %v1300_v10, %v1300_v10  ;;  %v1567_v29 = vrot.slane %v1553_v55, %v3192_v60 }
 0x2e8   : > { %4021 = vst [vmem:[#allocation23_spill] sm:$0xff] %v3499_v28  ;;  %v1711_v16 = vrot.slane %v1697_v17, %v3192_v60  ;;  %v3509_v62 = vrot.slane %v1742_v9, %v3205_v11  ;;  %v3512_v15 = vrot.slane %v1744_v8, %v3205_v11  ;;  %v3515_v23 = vrot.slane %v1033_v61, %v3192_v60 }
 0x2e9   : > { %4022 = vst [vmem:[#allocation24_spill] sm:$0xff] %v3504_v1  ;;  %v1446_v51 = vcombine.high %v1444_v24, %v1444_v24  ;;  %v3518_v28 = vrot.slane %v1177_v32, %v3192_v60  ;;  %v3521_v26 = vrot.slane %v1300_v10, %v3192_v60  ;;  %v1834_v55 = vrot.slane %v1820_v13, %v3192_v60 }
 0x2ea   : > { %4023 = vst [vmem:[#allocation25_spill] sm:$0xff] %v3509_v62  ;;  %4024 = vst [vmem:[#allocation26_spill] sm:$0xff] %v3512_v15  ;;  %v952_v17 = vcombine.high %v3461_v37, %v3461_v37  ;;  %v3527_v9 = vrot.slane %v1035_v56, %v3192_v60  ;;  %v3532_v61 = vrot.slane %v1179_v34, %v3192_v60 }
 0x2eb   : > { %4025 = vst [vmem:[#allocation27_spill] sm:$0xff] %v3518_v28  ;;  %v3535_v32 = vrot.slane %v1444_v24, %v3192_v60  ;;  %v3538_v10 = vrot.slane %v1302_v19, %v3192_v60  ;;  %v1569_v1 = vcombine.high %v1567_v29, %v1567_v29  ;;  %v1713_v13 = vcombine.high %v1711_v16, %v1711_v16 }
 0x2ec   : > { %4026 = vst [vmem:[#allocation28_spill] sm:$0xff] %v3532_v61  ;;  %v954_v37 = vcombine.high %v3464_v33, %v3464_v33  ;;  %v3547_v34 = vrot.slane %v1446_v51, %v3192_v60  ;;  %v1836_v62 = vcombine.high %v1834_v55, %v1834_v55  ;;  %v3560_v8 = vrot.slane %v1567_v29, %v3192_v60 }
 0x2ed   : > { %4027 = vst [vmem:[#allocation29_spill] sm:$0xff] %v3535_v32  ;;  %4028 = vst [vmem:[#allocation30_spill] sm:$0xff] %v3538_v10  ;;  %v3563_v51 = vrot.slane %v1711_v16, %v3192_v60  ;;  %v3566_v24 = vrot.slane %v1834_v55, %v3192_v60  ;;  %v3569_v19 = vrot.slane %v1569_v1, %v3192_v60 }
 0x2ee   : > { %4029 = vst [vmem:[#allocation31_spill] sm:$0xff] %v3547_v34  ;;  %4030 = vst [vmem:[#allocation32_spill] sm:$0xff] %v3560_v8  ;;  %v3572_v15 = vrot.slane %v1713_v13, %v3192_v60  ;;  %v3575_v33 = vrot.slane %v952_v17, %v3205_v11  ;;  %v3578_v56 = vrot.slane %v954_v37, %v3205_v11 }
 0x2ef   : > { %v1065_v29 = vcombine.high %v3515_v23, %v3515_v23  ;;  %v1067_v16 = vcombine.high %v3527_v9, %v3527_v9  ;;  %v1209_v55 = vcombine.high %v3518_v28, %v3518_v28  ;;  %v1211_v1 = vcombine.high %v3532_v61, %v3532_v61 }
 0x2f0   : > { %4031 = vst [vmem:[#allocation33_spill] sm:$0xff] %v3575_v33  ;;  %4032 = vst [vmem:[#allocation34_spill] sm:$0xff] %v3578_v56  ;;  %v3589_v13 = vrot.slane %v1836_v62, %v3192_v60  ;;  %v1332_v17 = vcombine.high %v3521_v26, %v3521_v26  ;;  %v1334_v37 = vcombine.high %v3538_v10, %v3538_v10 }
 0x2f1   : > { %v1476_v56 = vcombine.high %v3535_v32, %v3535_v32  ;;  %v1478_v61 = vcombine.high %v3547_v34, %v3547_v34  ;;  %v1599_v60 = vcombine.high %v3560_v8, %v3560_v8  ;;  %v3614_v28 = vrot.slane %v1065_v29, %v3205_v11 }
 0x2f2   : > { %4033 = vst [vmem:[#allocation35_spill] sm:$0xff] %v3589_v13  ;;  %v3617_v34 = vrot.slane %v1067_v16, %v3205_v11  ;;  %v3620_v8 = vrot.slane %v1209_v55, %v3205_v11  ;;  %v3623_v62 = vrot.slane %v1211_v1, %v3205_v11  ;;  %v3626_v10 = vrot.slane %v1332_v17, %v3205_v11 }
 0x2f3   : > { %v3629_v32 = vrot.slane %v1334_v37, %v3205_v11  ;;  %v3632_v33 = vrot.slane %v1476_v56, %v3205_v11  ;;  %v3639_v55 = vrot.slane %v1478_v61, %v3205_v11  ;;  %v3642_v1 = vrot.slane %v1599_v60, %v3205_v11 }
 0x2f4   : > { %4034 = vst [vmem:[#allocation36_spill] sm:$0xff] %v3626_v10  ;;  %v4039_v61 = vrot.slane %v3281_v48, %v3205_v11  ;;  %v4041_v37 = vrot.slane %v3199_v7, %v3205_v11  ;;  %v4043_v48 = vrot.slane %v3286_v49, %v3205_v11 }
 0x2f5   : > { %4035 = vst [vmem:[#allocation37_spill] sm:$0xff] %v3629_v32  ;;  %4036 = vst [vmem:[#allocation38_spill] sm:$0xff] %v3632_v33 }
 0x2f6   : > { %4037 = vst [vmem:[#allocation39_spill] sm:$0xff] %v3639_v55  ;;  %4038 = vst [vmem:[#allocation40_spill] sm:$0xff] %v3642_v1  ;;  %v4040_v1 = vrot.slane %v3298_v54, %v3205_v11  ;;  %v4044_v54 = vrot.slane %v3289_v50, %v3205_v11 }
 0x3a0   : > { %v3636_v16 = vpop.f32.mrb[22].mxu0 }
 0x3a1   : > { %v3648_v32 = vpop.f32.mrb[23].mxu0  ;;  %v1015_v56 = vmul.f32 %v3636_v16, %v3240_v27  ;;  %v1016_v29 = vmul.f32 %v3636_v16, %v3251_v30  ;;  %v1108_v60 = vmul.f32 %v3636_v16, %v4039_v61  ;;  %v1109_v17 = vmul.f32 %v3636_v16, %v4040_v1 }
 0x3a2   : > { %v902_v55 = vmul.f32 %v4041_v37, %v3648_v32  ;;  %v4042_v27 = vrot.slane %v3203_v41, %v3205_v11  ;;  %v995_v61 = vmul.f32 %v4043_v48, %v3648_v32  ;;  %v996_v1 = vmul.f32 %v4044_v54, %v3648_v32 }
 0x3a3   : > { %v997_v33 = vmul.f32 %v3364_v36, %v3648_v32  ;;  %v998_v7 = vmul.f32 %v3367_v38, %v3648_v32  ;;  %v1110_v41 = vmul.f32 %v3636_v16, %v3378_v59  ;;  %v1111_v37 = vmul.f32 %v3636_v16, %v3381_v6 }
 0x3a4   : > { %v903_v30 = vmul.f32 %v4042_v27, %v3648_v32  ;;  %v3686_v27 = vpop.f32.mrb[24].mxu0  ;;  %v1116_v49 = vadd.f32 %v1015_v56, %v902_v55  ;;  %v1118_v10 = vadd.f32 %v1108_v60, %v995_v61  ;;  %v1119_v13 = vadd.f32 %v1109_v17, %v996_v1 }
 0x3a5   : > { %v3688_v50 = vpop.f32.mrb[25].mxu0  ;;  %v1282_v36 = vmul.f32 %v3686_v27, %v3267_v42  ;;  %v1283_v38 = vmul.f32 %v3686_v27, %v3274_v45  ;;  %v4045_v59 = vrot.slane %v3350_v18, %v3205_v11  ;;  %v4046_v6 = vrot.slane %v3353_v22, %v3205_v11 }
 0x3a6   : > { %v1117_v48 = vadd.f32 %v1016_v29, %v903_v30  ;;  %v4047_v55 = vrot.slane %v3208_v12, %v3205_v11  ;;  %v4048_v42 = vrot.slane %v3213_v14, %v3205_v11  ;;  %v4049_v18 = vrot.slane %v3326_v39, %v3205_v11 }
 0x3a7   : > { %v1375_v54 = vmul.f32 %v3686_v27, %v4045_v59  ;;  %v1376_v29 = vmul.f32 %v3686_v27, %v4046_v6  ;;  %v4050_v22 = vrot.slane %v3329_v5, %v3205_v11  ;;  %v1120_v30 = vadd.f32 %v1110_v41, %v997_v33 }
 0x3a8   : > { %v1159_v17 = vmul.f32 %v4047_v55, %v3688_v50  ;;  %v1160_v45 = vmul.f32 %v4048_v42, %v3688_v50  ;;  %v1252_v56 = vmul.f32 %v4049_v18, %v3688_v50  ;;  %v1121_v61 = vadd.f32 %v1111_v37, %v998_v7  ;;  %v3722_v14 = vpop.f32.mrb[26].mxu0 }
 0x3a9   : > { %v1253_v60 = vmul.f32 %v4050_v22, %v3688_v50  ;;  %v1254_v12 = vmul.f32 %v3402_v2, %v3688_v50  ;;  %v1255_v1 = vmul.f32 %v3405_v31, %v3688_v50  ;;  %v3724_v42 = vpop.f32.mrb[27].mxu0  ;;  %v1549_v5 = vmul.f32 %v3722_v14, %v3292_v52 }
 0x3aa   : > { %v1260_v59 = vadd.f32 %v1159_v17, %v1116_v49  ;;  %v1261_v6 = vadd.f32 %v1160_v45, %v1117_v48  ;;  %v1262_v55 = vadd.f32 %v1252_v56, %v1118_v10  ;;  %v1550_v33 = vmul.f32 %v3722_v14, %v3295_v53 }
 0x3ab   : > { %v1263_v39 = vadd.f32 %v1253_v60, %v1119_v13  ;;  %v4051_v2 = vrot.slane %v3392_v40, %v3205_v11  ;;  %v4052_v31 = vrot.slane %v3395_v4, %v3205_v11  ;;  %v4053_v37 = vrot.slane %v3223_v20, %v3205_v11 }
 0x3ac   : > { %v1383_v10 = vadd.f32 %v1282_v36, %v1260_v59  ;;  %v1384_v13 = vadd.f32 %v1283_v38, %v1261_v6  ;;  %v4054_v53 = vrot.slane %v3226_v21, %v3205_v11  ;;  %v1385_v40 = vadd.f32 %v1375_v54, %v1262_v55  ;;  %v3754_v45 = vpop.f32.mrb[28].mxu0 }
 0x3ad   : > { %v1642_v7 = vmul.f32 %v3722_v14, %v4051_v2  ;;  %v1643_v41 = vmul.f32 %v3722_v14, %v4052_v31  ;;  %v1426_v52 = vmul.f32 %v4053_v37, %v3724_v42  ;;  %v1386_v48 = vadd.f32 %v1376_v29, %v1263_v39  ;;  %v3756_v21 = vpop.f32.mrb[29].mxu0 }
 0x3ae   : > { %v1427_v49 = vmul.f32 %v4054_v53, %v3724_v42  ;;  %v4055_v4 = vrot.slane %v3386_v57, %v3205_v11  ;;  %v4056_v36 = vrot.slane %v3389_v46, %v3205_v11  ;;  %v1264_v56 = vadd.f32 %v1254_v12, %v1120_v30  ;;  %v4064_v53 = vld [vmem:[#allocation19_spill] sm:$0xff] }
 0x3af   : > { %v1527_v20 = vadd.f32 %v1426_v52, %v1383_v10  ;;  %v1265_v22 = vadd.f32 %v1255_v1, %v1121_v61  ;;  %v1816_v54 = vmul.f32 %v3754_v45, %v3308_v58  ;;  %v1817_v57 = vmul.f32 %v3754_v45, %v3317_v63 }
 0x3b0   : > { %v1519_v17 = vmul.f32 %v4055_v4, %v3724_v42  ;;  %v1520_v38 = vmul.f32 %v4056_v36, %v3724_v42  ;;  %v1528_v18 = vadd.f32 %v1427_v49, %v1384_v13  ;;  %v4057_v46 = vrot.slane %v3235_v25, %v3205_v11  ;;  %v4063_v13 = vld [vmem:[#allocation16_spill] sm:$0xff] }
 0x3b1   : > { %v1650_v59 = vadd.f32 %v1549_v5, %v1527_v20  ;;  %v4058_v30 = vrot.slane %v3245_v0, %v3205_v11  ;;  %v4059_v58 = vrot.slane %v3418_v43, %v3205_v11  ;;  %v4060_v39 = vrot.slane %v3421_v44, %v3205_v11  ;;  %v4065_v49 = vld [vmem:[#allocation20_spill] sm:$0xff] }
 0x3b2   : > { %v1529_v29 = vadd.f32 %v1519_v17, %v1385_v40  ;;  %v1530_v60 = vadd.f32 %v1520_v38, %v1386_v48  ;;  %v1651_v6 = vadd.f32 %v1550_v33, %v1528_v18  ;;  %v1693_v55 = vmul.f32 %v4057_v46, %v3756_v21  ;;  %v4066_v38 = vld [vmem:[#allocation21_spill] sm:$0xff] }
 0x3b3   : > { %v1694_v61 = vmul.f32 %v4058_v30, %v3756_v21  ;;  %v1786_v63 = vmul.f32 %v4059_v58, %v3756_v21  ;;  %v1787_v5 = vmul.f32 %v4060_v39, %v3756_v21  ;;  %v4061_v2 = vrot.slane %v3424_v47, %v3205_v11  ;;  %v4072_v30 = vld [vmem:[#allocation18_spill] sm:$0xff] }
 0x3b4   : > { %v1652_v12 = vadd.f32 %v1642_v7, %v1529_v29  ;;  %v1653_v1 = vadd.f32 %v1643_v41, %v1530_v60  ;;  %v1794_v33 = vadd.f32 %v1693_v55, %v1650_v59  ;;  %v4062_v7 = vrot.slane %v3427_v3, %v3205_v11 }
 0x3b5   : > { %v1795_v25 = vadd.f32 %v1694_v61, %v1651_v6  ;;  %v1909_v0 = vmul.f32 %v3754_v45, %v4061_v2  ;;  %v1377_v10 = vmul.f32 %v3686_v27, %v3430_v35  ;;  %v1378_v44 = vmul.f32 %v3686_v27, %v4063_v13  ;;  %v4067_v35 = vld [vmem:[#allocation22_spill] sm:$0xff] }
 0x3b6   : > { %v1910_v31 = vmul.f32 %v3754_v45, %v4062_v7  ;;  %v1796_v41 = vadd.f32 %v1786_v63, %v1652_v12  ;;  %v1797_v43 = vadd.f32 %v1787_v5, %v1653_v1  ;;  %v1917_v37 = vadd.f32 %v1816_v54, %v1794_v33  ;;  %v4068_v54 = vld [vmem:[#allocation25_spill] sm:$0xff]  ;;  %v4069_v6 = vld [vmem:[#allocation26_spill] sm:$0xff]  ;;  %v4077_v7 = vld [vmem:[#allocation23_spill] sm:$0xff] }
 0x3b7   : > { %v1918_v52 = vadd.f32 %v1817_v57, %v1795_v25  ;;  %v1521_v47 = vmul.f32 %v4064_v53, %v3724_v42  ;;  %v1522_v40 = vmul.f32 %v4065_v49, %v3724_v42  ;;  %v1387_v4 = vadd.f32 %v1377_v10, %v1264_v56  ;;  %v4070_v56 = vld [vmem:[#allocation17_spill] sm:$0xff]  ;;  %v4079_v10 = vld [vmem:[#allocation27_spill] sm:$0xff] }
 0x3b8   : > { %v1919_v48 = vadd.f32 %v1909_v0, %v1796_v41  ;;  %v1920_v3 = vadd.f32 %v1910_v31, %v1797_v43  ;;  %v1388_v17 = vadd.f32 %v1378_v44, %v1265_v22  ;;  %v1644_v20 = vmul.f32 %v3722_v14, %v4066_v38  ;;  %v4078_v41 = vld [vmem:[#allocation24_spill] sm:$0xff] }
 0x3b9   : > { %v2468_v36 = vpack.c.bf16 %v1918_v52, %v1917_v37  ;;  %v1645_v18 = vmul.f32 %v3722_v14, %v4067_v35  ;;  %v1788_v57 = vmul.f32 %v4068_v54, %v3756_v21  ;;  %v1531_v60 = vadd.f32 %v1521_v47, %v1387_v4  ;;  %v4088_v35 = vld [vmem:[#allocation31_spill] sm:$0xff] }
 0x3ba   : > { %v2472_v29 = vpack.c.bf16 %v1920_v3, %v1919_v48  ;;  %v1532_v59 = vadd.f32 %v1522_v40, %v1388_v17  ;;  %v1789_v46 = vmul.f32 %v4069_v6, %v3756_v21  ;;  %v4071_v22 = vrot.slane %v4070_v56, %v3205_v11  ;;  %v4084_v3 = vld [vmem:[#allocation30_spill] sm:$0xff]  ;;  %v4090_v6 = vld [vmem:[#allocation32_spill] sm:$0xff] }
 0x3bb   : > { %2469 = vmatprep.subr.bf16.mxu1 %v2468_v36  ;;  %v4073_v61 = vrot.slane %v4072_v30, %v3205_v11  ;;  %v4074_v1 = vcombine.high %v3569_v19, %v3569_v19  ;;  %v1866_v63 = vcombine.high %v3566_v24, %v3566_v24  ;;  %v1654_v39 = vadd.f32 %v1644_v20, %v1531_v60 }
 0x3bc   : > { %v999_v55 = vmul.f32 %v4071_v22, %v3648_v32  ;;  %2471 = vmatpush3.bf16.msra.mxu1 %v2468_v36  ;;  %v1655_v5 = vadd.f32 %v1645_v18, %v1532_v59  ;;  %v4075_v33 = vrot.slane %v3515_v23, %v3205_v11  ;;  %v4076_v2 = vrot.slane %v3527_v9, %v3205_v11  ;;  %v4081_v23 = vld [vmem:[#allocation28_spill] sm:$0xff]  ;;  %v4086_v36 = vld [vmem:[#allocation29_spill] sm:$0xff] }
 0x3bd   : > { %v1000_v12 = vmul.f32 %v4073_v61, %v3648_v32  ;;  %v3814_v58 = vrot.slane %v4074_v1, %v3205_v11  ;;  %2473 = vmatprep.subr.bf16.mxu1 %v2472_v29  ;;  %v1911_v31 = vmul.f32 %v3754_v45, %v4077_v7  ;;  %v1912_v43 = vmul.f32 %v3754_v45, %v4078_v41 }
 0x3be   : > { %v1112_v25 = vmul.f32 %v3636_v16, %v4075_v33  ;;  %v1113_v0 = vmul.f32 %v3636_v16, %v4076_v2  ;;  %v4080_v13 = vrot.slane %v4079_v10, %v3205_v11  ;;  %v4082_v37 = vrot.slane %v4081_v23, %v3205_v11  ;;  %v4095_v33 = vld [vmem:[#allocation33_spill] sm:$0xff] }
 0x3bf   : > { %v1798_v9 = vadd.f32 %v1788_v57, %v1654_v39  ;;  %v1799_v53 = vadd.f32 %v1789_v46, %v1655_v5  ;;  %v4083_v40 = vrot.slane %v3521_v26, %v3205_v11  ;;  %v4085_v4 = vrot.slane %v4084_v3, %v3205_v11 }
 0x3c0   : > { %v1256_v44 = vmul.f32 %v4080_v13, %v3688_v50  ;;  %v1257_v52 = vmul.f32 %v4082_v37, %v3688_v50  ;;  %v1122_v47 = vadd.f32 %v1112_v25, %v999_v55  ;;  %v1123_v49 = vadd.f32 %v1113_v0, %v1000_v12  ;;  %2475 = vmatpush3.bf16.msra.mxu1 %v2472_v29 }
 0x3c1   : > { %v1379_v48 = vmul.f32 %v3686_v27, %v4083_v40  ;;  %v1380_v17 = vmul.f32 %v3686_v27, %v4085_v4  ;;  %v4087_v38 = vrot.slane %v4086_v36, %v3205_v11  ;;  %v4089_v18 = vrot.slane %v4088_v35, %v3205_v11 }
 0x3c2   : > { %v1921_v57 = vadd.f32 %v1911_v31, %v1798_v9  ;;  %v1922_v26 = vadd.f32 %v1912_v43, %v1799_v53  ;;  %v1266_v60 = vadd.f32 %v1256_v44, %v1122_v47  ;;  %v1267_v59 = vadd.f32 %v1257_v52, %v1123_v49  ;;  %v4100_v52 = vld [vmem:[#allocation36_spill] sm:$0xff]  ;;  %v4101_v53 = vld [vmem:[#allocation37_spill] sm:$0xff]  ;;  %v4102_v49 = vld [vmem:[#allocation38_spill] sm:$0xff] }
 0x3c3   : > { %v1523_v20 = vmul.f32 %v4087_v38, %v3724_v42  ;;  %v1524_v54 = vmul.f32 %v4089_v18, %v3724_v42  ;;  %v4091_v46 = vrot.slane %v4090_v6, %v3205_v11  ;;  %v4092_v22 = vrot.slane %v3569_v19, %v3205_v11  ;;  %v4096_v19 = vld [vmem:[#allocation34_spill] sm:$0xff] }
 0x3c4   : > { %v4093_v30 = vrot.slane %v3563_v51, %v3205_v11  ;;  %v4094_v29 = vcombine.high %v3563_v51, %v3563_v51  ;;  %v2476_v1 = vpack.c.bf16 %v1922_v26, %v1921_v57  ;;  %v1389_v39 = vadd.f32 %v1379_v48, %v1266_v60  ;;  %v4103_v48 = vld [vmem:[#allocation39_spill] sm:$0xff]  ;;  %v4106_v26 = vld [vmem:[#allocation40_spill] sm:$0xff] }
 0x3c5   : > { %v1646_v56 = vmul.f32 %v3722_v14, %v4091_v46  ;;  %v1647_v55 = vmul.f32 %v3722_v14, %v4092_v22  ;;  %v1390_v5 = vadd.f32 %v1380_v17, %v1267_v59  ;;  %v1001_v25 = vmul.f32 %v4095_v33, %v3648_v32 }
 0x3c6   : > { %v1790_v61 = vmul.f32 %v4093_v30, %v3756_v21  ;;  %v1773_v12 = vrot.slane %v4094_v29, %v3205_v11  ;;  %v1002_v2 = vmul.f32 %v4096_v19, %v3648_v32  ;;  %v1114_v0 = vmul.f32 %v3636_v16, %v3614_v28  ;;  %2477 = vmatprep.subr.bf16.mxu1 %v2476_v1 }
 0x3c7   : > { %v1115_v7 = vmul.f32 %v3636_v16, %v3617_v34  ;;  %v1258_v31 = vmul.f32 %v3620_v8, %v3688_v50  ;;  %v1533_v51 = vadd.f32 %v1523_v20, %v1389_v39  ;;  %v1534_v41 = vadd.f32 %v1524_v54, %v1390_v5  ;;  %2479 = vmatpush3.bf16.msra.mxu1 %v2476_v1  ;;  %v4099_v8 = vld [vmem:[#allocation35_spill] sm:$0xff]  ;;  %v1929_v39 = vld [vmem:[#allocation8 + $0x10] sm:$0xff] }
 0x3c8   : > { %v4097_v43 = vrot.slane %v3572_v15, %v3205_v11  ;;  %v1259_v32 = vmul.f32 %v3623_v62, %v3688_v50  ;;  %v1124_v13 = vadd.f32 %v1114_v0, %v1001_v25  ;;  %v4098_v34 = vcombine.high %v3572_v15, %v3572_v15 }
 0x3c9   : > { %v1125_v28 = vadd.f32 %v1115_v7, %v1002_v2  ;;  %v1868_v44 = vcombine.high %v4099_v8, %v4099_v8  ;;  %v1656_v23 = vadd.f32 %v1646_v56, %v1533_v51  ;;  %v1657_v37 = vadd.f32 %v1647_v55, %v1534_v41 }
 0x3ca   : > { %v1791_v10 = vmul.f32 %v4097_v43, %v3756_v21  ;;  %v1777_v16 = vrot.slane %v4098_v34, %v3205_v11  ;;  %v1381_v9 = vmul.f32 %v3686_v27, %v4100_v52  ;;  %v1382_v47 = vmul.f32 %v3686_v27, %v4101_v53 }
 0x3cb   : > { %v1268_v62 = vadd.f32 %v1258_v31, %v1124_v13  ;;  %v1269_v50 = vadd.f32 %v1259_v32, %v1125_v28  ;;  %v1525_v40 = vmul.f32 %v4102_v49, %v3724_v42  ;;  %v1526_v15 = vmul.f32 %v4103_v48, %v3724_v42 }
 0x3cc   : > { %v1800_v3 = vadd.f32 %v1790_v61, %v1656_v23  ;;  %v1801_v4 = vadd.f32 %v1791_v10, %v1657_v37  ;;  %v4104_v17 = vrot.slane %v3566_v24, %v3205_v11  ;;  %v4105_v38 = vrot.slane %v4099_v8, %v3205_v11 }
 0x3cd   : > { %v1391_v20 = vadd.f32 %v1381_v9, %v1268_v62  ;;  %v1392_v35 = vadd.f32 %v1382_v47, %v1269_v50  ;;  %v1896_v18 = vrot.slane %v1866_v63, %v3205_v11  ;;  %v1900_v54 = vrot.slane %v1868_v44, %v3205_v11 }
 0x3ce   : > { %v1913_v36 = vmul.f32 %v3754_v45, %v4104_v17  ;;  %v1914_v27 = vmul.f32 %v3754_v45, %v4105_v38  ;;  %v1648_v60 = vmul.f32 %v3722_v14, %v4106_v26  ;;  %v1649_v24 = vmul.f32 %v3722_v14, %v3814_v58 }
 0x3cf   : > { %v1535_v59 = vadd.f32 %v1525_v40, %v1391_v20  ;;  %v1536_v6 = vadd.f32 %v1526_v15, %v1392_v35  ;;  %v1792_v46 = vmul.f32 %v1773_v12, %v3756_v21  ;;  %v1793_v56 = vmul.f32 %v1777_v16, %v3756_v21  ;;  %v1928_v12 = vld [vmem:[#allocation7 + $0xf8] sm:$0xff] }
 0x3d0   : > { %v1923_v57 = vadd.f32 %v1913_v36, %v1800_v3  ;;  %v1924_v42 = vadd.f32 %v1914_v27, %v1801_v4  ;;  %v1915_v61 = vmul.f32 %v3754_v45, %v1896_v18  ;;  %v1916_v29 = vmul.f32 %v3754_v45, %v1900_v54  ;;  %v1930_v21 = vld [vmem:[#allocation8 + $0x18] sm:$0xff] }
 0x3d1   : > { %v1658_v55 = vadd.f32 %v1648_v60, %v1535_v59  ;;  %v1659_v63 = vadd.f32 %v1649_v24, %v1536_v6 }
 0x3d2   : > { %v2480_v22 = vpack.c.bf16 %v1924_v42, %v1923_v57 }
 0x3d3   : > { %v1802_v11 = vadd.f32 %v1792_v46, %v1658_v55  ;;  %v1803_v30 = vadd.f32 %v1793_v56, %v1659_v63 }
 0x3d4   : > { %2481 = vmatprep.subr.bf16.mxu1 %v2480_v22 }
 0x3d5   : > { %2483 = vmatpush3.bf16.msra.mxu1 %v2480_v22  ;;  %v1925_v14 = vadd.f32 %v1915_v61, %v1802_v11  ;;  %v1926_v58 = vadd.f32 %v1916_v29, %v1803_v30 }
 0x3d7   : > { %v2484_v1 = vpack.c.bf16 %v1926_v58, %v1925_v14 }
 0x3d9   : > { %2485 = vmatprep.subr.bf16.mxu1 %v2484_v1 }
 0x3da   : > { %2487 = vmatpush3.bf16.msra.mxu1 %v2484_v1 }
 0x3dd   : > { %2429 = vmatmul.mubr.msk.f32.vlgmr.msra.gmra.mrb[22].mxu1 %vm1931_vm8, %v1928_v12 }
 0x4b0   : > { %v2430_v5 = vpop.f32.mrb[22].mxu1 }
 0x4b1   : > { %v2010_v45 = vadd.f32 %v2430_v5, %v1930_v21  ;;  %v2004_v33 = vpop.f32.mrb[23].mxu1 }
 0x4b2   : > { %v2005_v25 = vadd.f32 %v2004_v33, %v1929_v39 }
 0x4b3   : > { %2014 = vst [vmem:[%s282_s30 + $0x8] sm:$0xff] %v2010_v45 }
 0x4b4   : > { %2013 = vst [vmem:[%s282_s30] sm:$0xff] %v2005_v25 }
 0x4b5   : > { %2751 = shalt.err (!%p2748_p10)
}
 0x4b6   : > { %s2752_s7 = scalar_lea.hbm %s3926_s6, 256  ;;  %s2756_s25 = scalar_lea.hbm %s3974_s4, 512 }
 0x4b7   : > { %p2753_p3 = scmp.ne.s32.totalorder %s3926_s6, %s2752_s7  ;;  %p2757_p1 = scmp.lt.u32.totalorder %s3926_s6, %s3974_s4 }
 0x4b8   : > { %p2758_p4 = scmp.lt.u32.totalorder %s2756_s25, %s2752_s7  ;;  %p2760_p2 = scmp.lt.u32.totalorder %s2752_s7, %s3926_s6 }
 0x4b9   : > { %p2754_p7 = pnand %p2753_p3, %p4107_p5 }
 0x4ba   : > { %p2759_p0 = por %p2758_p4, %p2757_p1 }
 0x4bb   : > { %p2755_p8 = pneg %p2754_p7 }
 0x4bc   : > { %p2761_p11 = por %p2760_p2, %p2759_p0 }
 0x4be   : > { %p2762_p12 = pnand %p2761_p11, %p2755_p8 }
 0x4c0   : > { %2765 = shalt.err (!%p2762_p12)
}
 0x4c1   : > { %s2830_s29 = smov 128   ;;  %s2831_s23 = smov 256  }
 0x4c2   : > { %s2832_s26 = smov 8  }
 0x4c3   : > { %2500 = dma.vmem_to_hbm [thread:$0]  (%p4107_p5), %s3921_s10, 256, %s3926_s6, %s2016_s14, %s2830_s29, %s2831_s23, %s2832_s26  }
 0x4c4 PF: > { %s2043_s30 = sand.u32 1, %s2804_s15   ;;  %p4108_p6 = scmp.ne.s32.totalorder %s3997_s28, 0 }
 0x4c5   : > { %p4109_p13 = scmp.ge.s32.totalorder %s2816_s18, 2  ;;  %s2044_s22 = scalar_lea.sflag [#allocation4], %s2043_s30 }
 0x4c7   : > { %p2517_p9 = pnand %p4109_p13, %p4108_p6 }
 0x4c9   : > { %2799 = dma.done.wait (!%p2517_p9), %s2044_s22, 256  }
 0x4ca   : > { %2801 = vsyncadd (!%p2517_p9), %s2044_s22, 4294967040  ;;  %p21_p10 = scmp.ge.s32.totalorder %s2883_s21, 4   ;;  %s4110_s15 = smov %s2808_s16 }
 0x4cb   : > { %s4111_s16 = smov %s2812_s17  ;;  %s4112_s17 = smov %s2895_s24 }
 0x4cc   : > { %s4113_s18 = smov %s2883_s21  ;;  %23 = sbr.rel (!%p21_p10) target bundleno = 12 (0xc), region = 102 }
 0x4d3   :  { %2049 = vsyncpa [#allocation3], 1 }
 0x4d4   :  { %2051 = vsyncpa [#allocation3 + $0x1], 1 }
 0x4d5   :  { %2052 = vsyncpa [#allocation6], 1 }
 0x4d6   :  { %2054 = vsyncpa [#allocation6 + $0x1], 1 }
 0x4d7   :  { %2055 = vsyncpa [#allocation9], 1 }
 0x4d8   :  { %2056 = vsyncpa [#allocation4], 1 }
 0x4d9   :  { %2058 = vsyncpa [#allocation4 + $0x1], 1 }

</bundles_post_ra>
